<compile_context>
chip_gen: v5e
topology: v5e:2x2
jax: 0.10.0
libtpu: 0.0.40
codegen_flags: <defaults>
</compile_context>

<pallas_src>
import jax
import jax.numpy as jnp
from jax.experimental import pallas as pl
from jax.experimental.pallas import tpu as pltpu


def _sigmoid(x):
    # tanh-form sigmoid: exact, overflow-safe, and lowers to the EUP (not a VALU divide).
    return 0.5 * jnp.tanh(0.5 * x) + 0.5


def _round_up(n, m):
    return -(-n // m) * m


def lstm_network_forward(x_btd, params):
    """x_btd: (B, T, input_size), batch_first like the PyTorch module.
    params follow torch.nn.LSTM / nn.Linear layout:
      w_ih (4H, D), w_hh (4H, H), b_ih (4H,), b_hh (4H,), w_lin (C, H), b_lin (C,)
    Returns (B, num_classes) = linear(h_n[-1])."""
    w_ih, w_hh, b_ih, b_hh, w_lin, b_lin = params
    B, T, D = x_btd.shape
    H = w_ih.shape[0] // 4
    C = w_lin.shape[0]

    B_pad = _round_up(B, 8)        # sublane multiple
    H_pad = _round_up(H, 128)      # each gate block gets a full lane multiple
    C_pad = _round_up(C, 128)      # lane-dense classifier output
    G_pad = 4 * H_pad

    # ---- wrapper-side weight prep (one-time, tiny) --------------------------
    # Gate-block padded input/recurrent weights, transposed to (K, 4*H_pad):
    def pad_gate_cols(w_t):  # w_t: (K, 4H) with i|f|g|o blocks of width H
        K = w_t.shape[0]
        w4 = w_t.reshape(K, 4, H)
        w4 = jnp.pad(w4, ((0, 0), (0, 0), (0, H_pad - H)))
        return w4.reshape(K, 4 * H_pad)

    w_ih_t = pad_gate_cols(jnp.transpose(w_ih).astype(jnp.float32))          # (D, G_pad)
    w_hh_t = pad_gate_cols(jnp.transpose(w_hh).astype(jnp.float32))          # (H, G_pad)
    w_hh_t = jnp.pad(w_hh_t, ((0, H_pad - H), (0, 0)))                       # (H_pad, G_pad)

    b_sum = (b_ih + b_hh).astype(jnp.float32).reshape(4, H)
    b_sum = jnp.pad(b_sum, ((0, 0), (0, H_pad - H))).reshape(1, G_pad)       # (1, G_pad) f32

    w_lin_t = jnp.transpose(w_lin).astype(jnp.float32)                        # (H, C)
    w_lin_t = jnp.pad(w_lin_t, ((0, H_pad - H), (0, C_pad - C)))              # (H_pad, C_pad)
    b_lin2 = jnp.pad(b_lin.astype(jnp.float32).reshape(1, C),
                     ((0, 0), (0, C_pad - C)))                                # (1, C_pad) f32

    # Time-major, batch-padded, flattened so the input projection is ONE matmul
    # and the per-step slice starts at a sublane-aligned row (t*B_pad).
    # TODO(synk): at production T*B express this reorder via a BlockSpec index_map
    # over a T-chunk grid axis instead of a wrapper transpose.
    x_pad = jnp.pad(x_btd.astype(jnp.float32), ((0, B_pad - B), (0, 0), (0, 0)))
    x_rows = jnp.transpose(x_pad, (1, 0, 2)).reshape(T * B_pad, D)

    # bf16 matmul inputs, f32 accumulation / state.
    x_rows = x_rows.astype(jnp.bfloat16)
    w_ih_t = w_ih_t.astype(jnp.bfloat16)
    w_hh_t = w_hh_t.astype(jnp.bfloat16)
    w_lin_t = w_lin_t.astype(jnp.bfloat16)

    def kernel(x_ref, wih_ref, whh_ref, bsum_ref, wlin_ref, blin_ref, out_ref):
        # One-shot input projection for ALL time steps, biases folded in:
        #   xp[t*B_pad + b, :] = x_t[b] @ W_ih^T + (b_ih + b_hh)
        xp = (jnp.dot(x_ref[...], wih_ref[...],
                      preferred_element_type=jnp.float32)
              + bsum_ref[...])                                  # (T*B_pad, G_pad) f32

        whh = whh_ref[...]                                      # (H_pad, G_pad) bf16, loaded once
        # TODO(synk): hold whh in MXU weight registers across steps for long T
        # (pltpu.matmul_push_rhs / matmul_acc_lhs), instead of re-pushing per step.

        h = jnp.zeros((B_pad, H_pad), jnp.float32)
        c = jnp.zeros((B_pad, H_pad), jnp.float32)

        # T is small & static: fully unroll; h/c stay in vregs. Slices are
        # sublane/lane aligned (multiples of 8 rows / 128 cols).
        for t in range(T):
            gates = xp[t * B_pad:(t + 1) * B_pad, :] + jnp.dot(
                h.astype(jnp.bfloat16), whh,
                preferred_element_type=jnp.float32)             # (B_pad, G_pad) f32
            i_g = _sigmoid(gates[:, 0 * H_pad:1 * H_pad])
            f_g = _sigmoid(gates[:, 1 * H_pad:2 * H_pad])
            g_g = jnp.tanh(gates[:, 2 * H_pad:3 * H_pad])
            o_g = _sigmoid(gates[:, 3 * H_pad:4 * H_pad])
            c = f_g * c + i_g * g_g
            h = o_g * jnp.tanh(c)

        # Final classifier on h_T (== linear(hidden[-1])), lane-dense padded output.
        out_ref[...] = (jnp.dot(h.astype(jnp.bfloat16), wlin_ref[...],
                                preferred_element_type=jnp.float32)
                        + blin_ref[...])

    out_pad = pl.pallas_call(
        kernel,
        out_shape=jax.ShapeDtypeStruct((B_pad, C_pad), jnp.float32),
        # Single invocation, everything resident in VMEM (total < 1 MiB at these sizes).
        in_specs=[pl.BlockSpec(memory_space=pltpu.MemorySpace.VMEM)] * 6,
        out_specs=pl.BlockSpec(memory_space=pltpu.MemorySpace.VMEM),
    )(x_rows, w_ih_t, w_hh_t, b_sum, w_lin_t, b_lin2)

    # Strip batch / class padding OUTSIDE the kernel.
    return out_pad[:B, :C]


def reference_forward(x_btd, params):
    """Pure-JAX f32 reference matching torch.nn.LSTM(batch_first=True) + Linear(h_n[-1])."""
    w_ih, w_hh, b_ih, b_hh, w_lin, b_lin = params
    B, T, D = x_btd.shape
    H = w_ih.shape[0] // 4
    h = jnp.zeros((B, H), jnp.float32)
    c = jnp.zeros((B, H), jnp.float32)
    for t in range(T):
        gates = x_btd[:, t, :] @ w_ih.T + b_ih + h @ w_hh.T + b_hh
        i = jax.nn.sigmoid(gates[:, 0:H])
        f = jax.nn.sigmoid(gates[:, H:2 * H])
        g = jnp.tanh(gates[:, 2 * H:3 * H])
        o = jax.nn.sigmoid(gates[:, 3 * H:4 * H])
        c = f * c + i * g
        h = o * jnp.tanh(c)
    return h @ w_lin.T + b_lin


if __name__ == "__main__":
    # Small, TPU-friendly sizes implied by the forward pass.
    B, T = 2, 8
    input_size, hidden_size, num_classes = 16, 32, 4

    key = jax.random.PRNGKey(0)
    kx, k1, k2, k3, k4, k5, k6 = jax.random.split(key, 7)

    x = jax.random.normal(kx, (B, T, input_size), dtype=jnp.float32)

    scale = 0.1
    w_ih = scale * jax.random.normal(k1, (4 * hidden_size, input_size), dtype=jnp.float32)
    w_hh = scale * jax.random.normal(k2, (4 * hidden_size, hidden_size), dtype=jnp.float32)
    b_ih = scale * jax.random.normal(k3, (4 * hidden_size,), dtype=jnp.float32)
    b_hh = scale * jax.random.normal(k4, (4 * hidden_size,), dtype=jnp.float32)
    w_lin = scale * jax.random.normal(k5, (num_classes, hidden_size), dtype=jnp.float32)
    b_lin = scale * jax.random.normal(k6, (num_classes,), dtype=jnp.float32)
    params = (w_ih, w_hh, b_ih, b_hh, w_lin, b_lin)

    out = lstm_network_forward(x, params)
    out = jax.block_until_ready(out)

    ref = reference_forward(x, params)
    assert out.shape == (B, num_classes), out.shape
    # Matmul inputs are bf16 (f32 accumulate); tolerance reflects bf16 input rounding.
    assert jnp.allclose(out, ref, atol=2e-2, rtol=2e-2), (out, ref)

    print("KERNEL_OK")
</pallas_src>

<mosaic_0001>
module attributes {stable_mosaic.version = 11 : i64} {
  func.func @kernel(%arg0: memref<64x16xbf16, #tpu.memory_space<vmem>>, %arg1: memref<16x512xbf16, #tpu.memory_space<vmem>>, %arg2: memref<128x512xbf16, #tpu.memory_space<vmem>>, %arg3: memref<1x512xf32, #tpu.memory_space<vmem>>, %arg4: memref<128x128xbf16, #tpu.memory_space<vmem>>, %arg5: memref<1x128xf32, #tpu.memory_space<vmem>>, %arg6: memref<8x128xf32, #tpu.memory_space<vmem>>) attributes {dimension_semantics = [], scalar_prefetch = 0 : i64, scratch_operands = 0 : i64, tpu.core_type = #tpu.core_type<tc>} {
    %c0 = arith.constant 0 : index
    %c0_0 = arith.constant 0 : index
    %0 = vector.load %arg0[%c0, %c0_0] : memref<64x16xbf16, #tpu.memory_space<vmem>>, vector<64x16xbf16>
    %c0_1 = arith.constant 0 : index
    %c0_2 = arith.constant 0 : index
    %1 = vector.load %arg1[%c0_1, %c0_2] : memref<16x512xbf16, #tpu.memory_space<vmem>>, vector<16x512xbf16>
    %cst = arith.constant dense<0.000000e+00> : vector<64x512xf32>
    %2 = tpu.matmul %0, %1, %cst {dimension_numbers = #tpu.dot_dimension_numbers<[1], [0], [0], [1], [0, 0, 1, 1], [], []>} : vector<64x16xbf16>, vector<16x512xbf16>, vector<64x512xf32> -> vector<64x512xf32>
    %c0_3 = arith.constant 0 : index
    %c0_4 = arith.constant 0 : index
    %3 = vector.load %arg3[%c0_3, %c0_4] : memref<1x512xf32, #tpu.memory_space<vmem>>, vector<1x512xf32>
    %4 = vector.broadcast %3 : vector<1x512xf32> to vector<64x512xf32>
    %5 = arith.addf %2, %4 : vector<64x512xf32>
    %c0_5 = arith.constant 0 : index
    %c0_6 = arith.constant 0 : index
    %6 = vector.load %arg2[%c0_5, %c0_6] : memref<128x512xbf16, #tpu.memory_space<vmem>>, vector<128x512xbf16>
    %cst_7 = arith.constant 0.000000e+00 : f32
    %7 = vector.broadcast %cst_7 : f32 to vector<8x128xf32>
    %cst_8 = arith.constant 0.000000e+00 : f32
    %8 = vector.broadcast %cst_8 : f32 to vector<8x128xf32>
    %9 = vector.extract_strided_slice %5 {offsets = [0, 0], sizes = [8, 512], strides = [1, 1]} : vector<64x512xf32> to vector<8x512xf32>
    %10 = arith.truncf %7 : vector<8x128xf32> to vector<8x128xbf16>
    %cst_9 = arith.constant dense<0.000000e+00> : vector<8x512xf32>
    %11 = tpu.matmul %10, %6, %cst_9 {dimension_numbers = #tpu.dot_dimension_numbers<[1], [0], [0], [1], [0, 0, 1, 1], [], []>} : vector<8x128xbf16>, vector<128x512xbf16>, vector<8x512xf32> -> vector<8x512xf32>
    %12 = arith.addf %9, %11 : vector<8x512xf32>
    %13 = vector.extract_strided_slice %12 {offsets = [0, 0], sizes = [8, 128], strides = [1, 1]} : vector<8x512xf32> to vector<8x128xf32>
    %cst_10 = arith.constant 5.000000e-01 : f32
    %14 = vector.broadcast %cst_10 : f32 to vector<8x128xf32>
    %15 = arith.mulf %14, %13 : vector<8x128xf32>
    %16 = math.tanh %15 : vector<8x128xf32>
    %cst_11 = arith.constant 5.000000e-01 : f32
    %17 = vector.broadcast %cst_11 : f32 to vector<8x128xf32>
    %18 = arith.mulf %17, %16 : vector<8x128xf32>
    %cst_12 = arith.constant 5.000000e-01 : f32
    %19 = vector.broadcast %cst_12 : f32 to vector<8x128xf32>
    %20 = arith.addf %18, %19 : vector<8x128xf32>
    %21 = vector.extract_strided_slice %12 {offsets = [0, 128], sizes = [8, 128], strides = [1, 1]} : vector<8x512xf32> to vector<8x128xf32>
    %cst_13 = arith.constant 5.000000e-01 : f32
    %22 = vector.broadcast %cst_13 : f32 to vector<8x128xf32>
    %23 = arith.mulf %22, %21 : vector<8x128xf32>
    %24 = math.tanh %23 : vector<8x128xf32>
    %cst_14 = arith.constant 5.000000e-01 : f32
    %25 = vector.broadcast %cst_14 : f32 to vector<8x128xf32>
    %26 = arith.mulf %25, %24 : vector<8x128xf32>
    %cst_15 = arith.constant 5.000000e-01 : f32
    %27 = vector.broadcast %cst_15 : f32 to vector<8x128xf32>
    %28 = arith.addf %26, %27 : vector<8x128xf32>
    %29 = vector.extract_strided_slice %12 {offsets = [0, 256], sizes = [8, 128], strides = [1, 1]} : vector<8x512xf32> to vector<8x128xf32>
    %30 = math.tanh %29 : vector<8x128xf32>
    %31 = vector.extract_strided_slice %12 {offsets = [0, 384], sizes = [8, 128], strides = [1, 1]} : vector<8x512xf32> to vector<8x128xf32>
    %cst_16 = arith.constant 5.000000e-01 : f32
    %32 = vector.broadcast %cst_16 : f32 to vector<8x128xf32>
    %33 = arith.mulf %32, %31 : vector<8x128xf32>
    %34 = math.tanh %33 : vector<8x128xf32>
    %cst_17 = arith.constant 5.000000e-01 : f32
    %35 = vector.broadcast %cst_17 : f32 to vector<8x128xf32>
    %36 = arith.mulf %35, %34 : vector<8x128xf32>
    %cst_18 = arith.constant 5.000000e-01 : f32
    %37 = vector.broadcast %cst_18 : f32 to vector<8x128xf32>
    %38 = arith.addf %36, %37 : vector<8x128xf32>
    %39 = arith.mulf %28, %8 : vector<8x128xf32>
    %40 = arith.mulf %20, %30 : vector<8x128xf32>
    %41 = arith.addf %39, %40 : vector<8x128xf32>
    %42 = math.tanh %41 : vector<8x128xf32>
    %43 = arith.mulf %38, %42 : vector<8x128xf32>
    %44 = vector.extract_strided_slice %5 {offsets = [8, 0], sizes = [8, 512], strides = [1, 1]} : vector<64x512xf32> to vector<8x512xf32>
    %45 = arith.truncf %43 : vector<8x128xf32> to vector<8x128xbf16>
    %cst_19 = arith.constant dense<0.000000e+00> : vector<8x512xf32>
    %46 = tpu.matmul %45, %6, %cst_19 {dimension_numbers = #tpu.dot_dimension_numbers<[1], [0], [0], [1], [0, 0, 1, 1], [], []>} : vector<8x128xbf16>, vector<128x512xbf16>, vector<8x512xf32> -> vector<8x512xf32>
    %47 = arith.addf %44, %46 : vector<8x512xf32>
    %48 = vector.extract_strided_slice %47 {offsets = [0, 0], sizes = [8, 128], strides = [1, 1]} : vector<8x512xf32> to vector<8x128xf32>
    %cst_20 = arith.constant 5.000000e-01 : f32
    %49 = vector.broadcast %cst_20 : f32 to vector<8x128xf32>
    %50 = arith.mulf %49, %48 : vector<8x128xf32>
    %51 = math.tanh %50 : vector<8x128xf32>
    %cst_21 = arith.constant 5.000000e-01 : f32
    %52 = vector.broadcast %cst_21 : f32 to vector<8x128xf32>
    %53 = arith.mulf %52, %51 : vector<8x128xf32>
    %cst_22 = arith.constant 5.000000e-01 : f32
    %54 = vector.broadcast %cst_22 : f32 to vector<8x128xf32>
    %55 = arith.addf %53, %54 : vector<8x128xf32>
    %56 = vector.extract_strided_slice %47 {offsets = [0, 128], sizes = [8, 128], strides = [1, 1]} : vector<8x512xf32> to vector<8x128xf32>
    %cst_23 = arith.constant 5.000000e-01 : f32
    %57 = vector.broadcast %cst_23 : f32 to vector<8x128xf32>
    %58 = arith.mulf %57, %56 : vector<8x128xf32>
    %59 = math.tanh %58 : vector<8x128xf32>
    %cst_24 = arith.constant 5.000000e-01 : f32
    %60 = vector.broadcast %cst_24 : f32 to vector<8x128xf32>
    %61 = arith.mulf %60, %59 : vector<8x128xf32>
    %cst_25 = arith.constant 5.000000e-01 : f32
    %62 = vector.broadcast %cst_25 : f32 to vector<8x128xf32>
    %63 = arith.addf %61, %62 : vector<8x128xf32>
    %64 = vector.extract_strided_slice %47 {offsets = [0, 256], sizes = [8, 128], strides = [1, 1]} : vector<8x512xf32> to vector<8x128xf32>
    %65 = math.tanh %64 : vector<8x128xf32>
    %66 = vector.extract_strided_slice %47 {offsets = [0, 384], sizes = [8, 128], strides = [1, 1]} : vector<8x512xf32> to vector<8x128xf32>
    %cst_26 = arith.constant 5.000000e-01 : f32
    %67 = vector.broadcast %cst_26 : f32 to vector<8x128xf32>
    %68 = arith.mulf %67, %66 : vector<8x128xf32>
    %69 = math.tanh %68 : vector<8x128xf32>
    %cst_27 = arith.constant 5.000000e-01 : f32
    %70 = vector.broadcast %cst_27 : f32 to vector<8x128xf32>
    %71 = arith.mulf %70, %69 : vector<8x128xf32>
    %cst_28 = arith.constant 5.000000e-01 : f32
    %72 = vector.broadcast %cst_28 : f32 to vector<8x128xf32>
    %73 = arith.addf %71, %72 : vector<8x128xf32>
    %74 = arith.mulf %63, %41 : vector<8x128xf32>
    %75 = arith.mulf %55, %65 : vector<8x128xf32>
    %76 = arith.addf %74, %75 : vector<8x128xf32>
    %77 = math.tanh %76 : vector<8x128xf32>
    %78 = arith.mulf %73, %77 : vector<8x128xf32>
    %79 = vector.extract_strided_slice %5 {offsets = [16, 0], sizes = [8, 512], strides = [1, 1]} : vector<64x512xf32> to vector<8x512xf32>
    %80 = arith.truncf %78 : vector<8x128xf32> to vector<8x128xbf16>
    %cst_29 = arith.constant dense<0.000000e+00> : vector<8x512xf32>
    %81 = tpu.matmul %80, %6, %cst_29 {dimension_numbers = #tpu.dot_dimension_numbers<[1], [0], [0], [1], [0, 0, 1, 1], [], []>} : vector<8x128xbf16>, vector<128x512xbf16>, vector<8x512xf32> -> vector<8x512xf32>
    %82 = arith.addf %79, %81 : vector<8x512xf32>
    %83 = vector.extract_strided_slice %82 {offsets = [0, 0], sizes = [8, 128], strides = [1, 1]} : vector<8x512xf32> to vector<8x128xf32>
    %cst_30 = arith.constant 5.000000e-01 : f32
    %84 = vector.broadcast %cst_30 : f32 to vector<8x128xf32>
    %85 = arith.mulf %84, %83 : vector<8x128xf32>
    %86 = math.tanh %85 : vector<8x128xf32>
    %cst_31 = arith.constant 5.000000e-01 : f32
    %87 = vector.broadcast %cst_31 : f32 to vector<8x128xf32>
    %88 = arith.mulf %87, %86 : vector<8x128xf32>
    %cst_32 = arith.constant 5.000000e-01 : f32
    %89 = vector.broadcast %cst_32 : f32 to vector<8x128xf32>
    %90 = arith.addf %88, %89 : vector<8x128xf32>
    %91 = vector.extract_strided_slice %82 {offsets = [0, 128], sizes = [8, 128], strides = [1, 1]} : vector<8x512xf32> to vector<8x128xf32>
    %cst_33 = arith.constant 5.000000e-01 : f32
    %92 = vector.broadcast %cst_33 : f32 to vector<8x128xf32>
    %93 = arith.mulf %92, %91 : vector<8x128xf32>
    %94 = math.tanh %93 : vector<8x128xf32>
    %cst_34 = arith.constant 5.000000e-01 : f32
    %95 = vector.broadcast %cst_34 : f32 to vector<8x128xf32>
    %96 = arith.mulf %95, %94 : vector<8x128xf32>
    %cst_35 = arith.constant 5.000000e-01 : f32
    %97 = vector.broadcast %cst_35 : f32 to vector<8x128xf32>
    %98 = arith.addf %96, %97 : vector<8x128xf32>
    %99 = vector.extract_strided_slice %82 {offsets = [0, 256], sizes = [8, 128], strides = [1, 1]} : vector<8x512xf32> to vector<8x128xf32>
    %100 = math.tanh %99 : vector<8x128xf32>
    %101 = vector.extract_strided_slice %82 {offsets = [0, 384], sizes = [8, 128], strides = [1, 1]} : vector<8x512xf32> to vector<8x128xf32>
    %cst_36 = arith.constant 5.000000e-01 : f32
    %102 = vector.broadcast %cst_36 : f32 to vector<8x128xf32>
    %103 = arith.mulf %102, %101 : vector<8x128xf32>
    %104 = math.tanh %103 : vector<8x128xf32>
    %cst_37 = arith.constant 5.000000e-01 : f32
    %105 = vector.broadcast %cst_37 : f32 to vector<8x128xf32>
    %106 = arith.mulf %105, %104 : vector<8x128xf32>
    %cst_38 = arith.constant 5.000000e-01 : f32
    %107 = vector.broadcast %cst_38 : f32 to vector<8x128xf32>
    %108 = arith.addf %106, %107 : vector<8x128xf32>
    %109 = arith.mulf %98, %76 : vector<8x128xf32>
    %110 = arith.mulf %90, %100 : vector<8x128xf32>
    %111 = arith.addf %109, %110 : vector<8x128xf32>
    %112 = math.tanh %111 : vector<8x128xf32>
    %113 = arith.mulf %108, %112 : vector<8x128xf32>
    %114 = vector.extract_strided_slice %5 {offsets = [24, 0], sizes = [8, 512], strides = [1, 1]} : vector<64x512xf32> to vector<8x512xf32>
    %115 = arith.truncf %113 : vector<8x128xf32> to vector<8x128xbf16>
    %cst_39 = arith.constant dense<0.000000e+00> : vector<8x512xf32>
    %116 = tpu.matmul %115, %6, %cst_39 {dimension_numbers = #tpu.dot_dimension_numbers<[1], [0], [0], [1], [0, 0, 1, 1], [], []>} : vector<8x128xbf16>, vector<128x512xbf16>, vector<8x512xf32> -> vector<8x512xf32>
    %117 = arith.addf %114, %116 : vector<8x512xf32>
    %118 = vector.extract_strided_slice %117 {offsets = [0, 0], sizes = [8, 128], strides = [1, 1]} : vector<8x512xf32> to vector<8x128xf32>
    %cst_40 = arith.constant 5.000000e-01 : f32
    %119 = vector.broadcast %cst_40 : f32 to vector<8x128xf32>
    %120 = arith.mulf %119, %118 : vector<8x128xf32>
    %121 = math.tanh %120 : vector<8x128xf32>
    %cst_41 = arith.constant 5.000000e-01 : f32
    %122 = vector.broadcast %cst_41 : f32 to vector<8x128xf32>
    %123 = arith.mulf %122, %121 : vector<8x128xf32>
    %cst_42 = arith.constant 5.000000e-01 : f32
    %124 = vector.broadcast %cst_42 : f32 to vector<8x128xf32>
    %125 = arith.addf %123, %124 : vector<8x128xf32>
    %126 = vector.extract_strided_slice %117 {offsets = [0, 128], sizes = [8, 128], strides = [1, 1]} : vector<8x512xf32> to vector<8x128xf32>
    %cst_43 = arith.constant 5.000000e-01 : f32
    %127 = vector.broadcast %cst_43 : f32 to vector<8x128xf32>
    %128 = arith.mulf %127, %126 : vector<8x128xf32>
    %129 = math.tanh %128 : vector<8x128xf32>
    %cst_44 = arith.constant 5.000000e-01 : f32
    %130 = vector.broadcast %cst_44 : f32 to vector<8x128xf32>
    %131 = arith.mulf %130, %129 : vector<8x128xf32>
    %cst_45 = arith.constant 5.000000e-01 : f32
    %132 = vector.broadcast %cst_45 : f32 to vector<8x128xf32>
    %133 = arith.addf %131, %132 : vector<8x128xf32>
    %134 = vector.extract_strided_slice %117 {offsets = [0, 256], sizes = [8, 128], strides = [1, 1]} : vector<8x512xf32> to vector<8x128xf32>
    %135 = math.tanh %134 : vector<8x128xf32>
    %136 = vector.extract_strided_slice %117 {offsets = [0, 384], sizes = [8, 128], strides = [1, 1]} : vector<8x512xf32> to vector<8x128xf32>
    %cst_46 = arith.constant 5.000000e-01 : f32
    %137 = vector.broadcast %cst_46 : f32 to vector<8x128xf32>
    %138 = arith.mulf %137, %136 : vector<8x128xf32>
    %139 = math.tanh %138 : vector<8x128xf32>
    %cst_47 = arith.constant 5.000000e-01 : f32
    %140 = vector.broadcast %cst_47 : f32 to vector<8x128xf32>
    %141 = arith.mulf %140, %139 : vector<8x128xf32>
    %cst_48 = arith.constant 5.000000e-01 : f32
    %142 = vector.broadcast %cst_48 : f32 to vector<8x128xf32>
    %143 = arith.addf %141, %142 : vector<8x128xf32>
    %144 = arith.mulf %133, %111 : vector<8x128xf32>
    %145 = arith.mulf %125, %135 : vector<8x128xf32>
    %146 = arith.addf %144, %145 : vector<8x128xf32>
    %147 = math.tanh %146 : vector<8x128xf32>
    %148 = arith.mulf %143, %147 : vector<8x128xf32>
    %149 = vector.extract_strided_slice %5 {offsets = [32, 0], sizes = [8, 512], strides = [1, 1]} : vector<64x512xf32> to vector<8x512xf32>
    %150 = arith.truncf %148 : vector<8x128xf32> to vector<8x128xbf16>
    %cst_49 = arith.constant dense<0.000000e+00> : vector<8x512xf32>
    %151 = tpu.matmul %150, %6, %cst_49 {dimension_numbers = #tpu.dot_dimension_numbers<[1], [0], [0], [1], [0, 0, 1, 1], [], []>} : vector<8x128xbf16>, vector<128x512xbf16>, vector<8x512xf32> -> vector<8x512xf32>
    %152 = arith.addf %149, %151 : vector<8x512xf32>
    %153 = vector.extract_strided_slice %152 {offsets = [0, 0], sizes = [8, 128], strides = [1, 1]} : vector<8x512xf32> to vector<8x128xf32>
    %cst_50 = arith.constant 5.000000e-01 : f32
    %154 = vector.broadcast %cst_50 : f32 to vector<8x128xf32>
    %155 = arith.mulf %154, %153 : vector<8x128xf32>
    %156 = math.tanh %155 : vector<8x128xf32>
    %cst_51 = arith.constant 5.000000e-01 : f32
    %157 = vector.broadcast %cst_51 : f32 to vector<8x128xf32>
    %158 = arith.mulf %157, %156 : vector<8x128xf32>
    %cst_52 = arith.constant 5.000000e-01 : f32
    %159 = vector.broadcast %cst_52 : f32 to vector<8x128xf32>
    %160 = arith.addf %158, %159 : vector<8x128xf32>
    %161 = vector.extract_strided_slice %152 {offsets = [0, 128], sizes = [8, 128], strides = [1, 1]} : vector<8x512xf32> to vector<8x128xf32>
    %cst_53 = arith.constant 5.000000e-01 : f32
    %162 = vector.broadcast %cst_53 : f32 to vector<8x128xf32>
    %163 = arith.mulf %162, %161 : vector<8x128xf32>
    %164 = math.tanh %163 : vector<8x128xf32>
    %cst_54 = arith.constant 5.000000e-01 : f32
    %165 = vector.broadcast %cst_54 : f32 to vector<8x128xf32>
    %166 = arith.mulf %165, %164 : vector<8x128xf32>
    %cst_55 = arith.constant 5.000000e-01 : f32
    %167 = vector.broadcast %cst_55 : f32 to vector<8x128xf32>
    %168 = arith.addf %166, %167 : vector<8x128xf32>
    %169 = vector.extract_strided_slice %152 {offsets = [0, 256], sizes = [8, 128], strides = [1, 1]} : vector<8x512xf32> to vector<8x128xf32>
    %170 = math.tanh %169 : vector<8x128xf32>
    %171 = vector.extract_strided_slice %152 {offsets = [0, 384], sizes = [8, 128], strides = [1, 1]} : vector<8x512xf32> to vector<8x128xf32>
    %cst_56 = arith.constant 5.000000e-01 : f32
    %172 = vector.broadcast %cst_56 : f32 to vector<8x128xf32>
    %173 = arith.mulf %172, %171 : vector<8x128xf32>
    %174 = math.tanh %173 : vector<8x128xf32>
    %cst_57 = arith.constant 5.000000e-01 : f32
    %175 = vector.broadcast %cst_57 : f32 to vector<8x128xf32>
    %176 = arith.mulf %175, %174 : vector<8x128xf32>
    %cst_58 = arith.constant 5.000000e-01 : f32
    %177 = vector.broadcast %cst_58 : f32 to vector<8x128xf32>
    %178 = arith.addf %176, %177 : vector<8x128xf32>
    %179 = arith.mulf %168, %146 : vector<8x128xf32>
    %180 = arith.mulf %160, %170 : vector<8x128xf32>
    %181 = arith.addf %179, %180 : vector<8x128xf32>
    %182 = math.tanh %181 : vector<8x128xf32>
    %183 = arith.mulf %178, %182 : vector<8x128xf32>
    %184 = vector.extract_strided_slice %5 {offsets = [40, 0], sizes = [8, 512], strides = [1, 1]} : vector<64x512xf32> to vector<8x512xf32>
    %185 = arith.truncf %183 : vector<8x128xf32> to vector<8x128xbf16>
    %cst_59 = arith.constant dense<0.000000e+00> : vector<8x512xf32>
    %186 = tpu.matmul %185, %6, %cst_59 {dimension_numbers = #tpu.dot_dimension_numbers<[1], [0], [0], [1], [0, 0, 1, 1], [], []>} : vector<8x128xbf16>, vector<128x512xbf16>, vector<8x512xf32> -> vector<8x512xf32>
    %187 = arith.addf %184, %186 : vector<8x512xf32>
    %188 = vector.extract_strided_slice %187 {offsets = [0, 0], sizes = [8, 128], strides = [1, 1]} : vector<8x512xf32> to vector<8x128xf32>
    %cst_60 = arith.constant 5.000000e-01 : f32
    %189 = vector.broadcast %cst_60 : f32 to vector<8x128xf32>
    %190 = arith.mulf %189, %188 : vector<8x128xf32>
    %191 = math.tanh %190 : vector<8x128xf32>
    %cst_61 = arith.constant 5.000000e-01 : f32
    %192 = vector.broadcast %cst_61 : f32 to vector<8x128xf32>
    %193 = arith.mulf %192, %191 : vector<8x128xf32>
    %cst_62 = arith.constant 5.000000e-01 : f32
    %194 = vector.broadcast %cst_62 : f32 to vector<8x128xf32>
    %195 = arith.addf %193, %194 : vector<8x128xf32>
    %196 = vector.extract_strided_slice %187 {offsets = [0, 128], sizes = [8, 128], strides = [1, 1]} : vector<8x512xf32> to vector<8x128xf32>
    %cst_63 = arith.constant 5.000000e-01 : f32
    %197 = vector.broadcast %cst_63 : f32 to vector<8x128xf32>
    %198 = arith.mulf %197, %196 : vector<8x128xf32>
    %199 = math.tanh %198 : vector<8x128xf32>
    %cst_64 = arith.constant 5.000000e-01 : f32
    %200 = vector.broadcast %cst_64 : f32 to vector<8x128xf32>
    %201 = arith.mulf %200, %199 : vector<8x128xf32>
    %cst_65 = arith.constant 5.000000e-01 : f32
    %202 = vector.broadcast %cst_65 : f32 to vector<8x128xf32>
    %203 = arith.addf %201, %202 : vector<8x128xf32>
    %204 = vector.extract_strided_slice %187 {offsets = [0, 256], sizes = [8, 128], strides = [1, 1]} : vector<8x512xf32> to vector<8x128xf32>
    %205 = math.tanh %204 : vector<8x128xf32>
    %206 = vector.extract_strided_slice %187 {offsets = [0, 384], sizes = [8, 128], strides = [1, 1]} : vector<8x512xf32> to vector<8x128xf32>
    %cst_66 = arith.constant 5.000000e-01 : f32
    %207 = vector.broadcast %cst_66 : f32 to vector<8x128xf32>
    %208 = arith.mulf %207, %206 : vector<8x128xf32>
    %209 = math.tanh %208 : vector<8x128xf32>
    %cst_67 = arith.constant 5.000000e-01 : f32
    %210 = vector.broadcast %cst_67 : f32 to vector<8x128xf32>
    %211 = arith.mulf %210, %209 : vector<8x128xf32>
    %cst_68 = arith.constant 5.000000e-01 : f32
    %212 = vector.broadcast %cst_68 : f32 to vector<8x128xf32>
    %213 = arith.addf %211, %212 : vector<8x128xf32>
    %214 = arith.mulf %203, %181 : vector<8x128xf32>
    %215 = arith.mulf %195, %205 : vector<8x128xf32>
    %216 = arith.addf %214, %215 : vector<8x128xf32>
    %217 = math.tanh %216 : vector<8x128xf32>
    %218 = arith.mulf %213, %217 : vector<8x128xf32>
    %219 = vector.extract_strided_slice %5 {offsets = [48, 0], sizes = [8, 512], strides = [1, 1]} : vector<64x512xf32> to vector<8x512xf32>
    %220 = arith.truncf %218 : vector<8x128xf32> to vector<8x128xbf16>
    %cst_69 = arith.constant dense<0.000000e+00> : vector<8x512xf32>
    %221 = tpu.matmul %220, %6, %cst_69 {dimension_numbers = #tpu.dot_dimension_numbers<[1], [0], [0], [1], [0, 0, 1, 1], [], []>} : vector<8x128xbf16>, vector<128x512xbf16>, vector<8x512xf32> -> vector<8x512xf32>
    %222 = arith.addf %219, %221 : vector<8x512xf32>
    %223 = vector.extract_strided_slice %222 {offsets = [0, 0], sizes = [8, 128], strides = [1, 1]} : vector<8x512xf32> to vector<8x128xf32>
    %cst_70 = arith.constant 5.000000e-01 : f32
    %224 = vector.broadcast %cst_70 : f32 to vector<8x128xf32>
    %225 = arith.mulf %224, %223 : vector<8x128xf32>
    %226 = math.tanh %225 : vector<8x128xf32>
    %cst_71 = arith.constant 5.000000e-01 : f32
    %227 = vector.broadcast %cst_71 : f32 to vector<8x128xf32>
    %228 = arith.mulf %227, %226 : vector<8x128xf32>
    %cst_72 = arith.constant 5.000000e-01 : f32
    %229 = vector.broadcast %cst_72 : f32 to vector<8x128xf32>
    %230 = arith.addf %228, %229 : vector<8x128xf32>
    %231 = vector.extract_strided_slice %222 {offsets = [0, 128], sizes = [8, 128], strides = [1, 1]} : vector<8x512xf32> to vector<8x128xf32>
    %cst_73 = arith.constant 5.000000e-01 : f32
    %232 = vector.broadcast %cst_73 : f32 to vector<8x128xf32>
    %233 = arith.mulf %232, %231 : vector<8x128xf32>
    %234 = math.tanh %233 : vector<8x128xf32>
    %cst_74 = arith.constant 5.000000e-01 : f32
    %235 = vector.broadcast %cst_74 : f32 to vector<8x128xf32>
    %236 = arith.mulf %235, %234 : vector<8x128xf32>
    %cst_75 = arith.constant 5.000000e-01 : f32
    %237 = vector.broadcast %cst_75 : f32 to vector<8x128xf32>
    %238 = arith.addf %236, %237 : vector<8x128xf32>
    %239 = vector.extract_strided_slice %222 {offsets = [0, 256], sizes = [8, 128], strides = [1, 1]} : vector<8x512xf32> to vector<8x128xf32>
    %240 = math.tanh %239 : vector<8x128xf32>
    %241 = vector.extract_strided_slice %222 {offsets = [0, 384], sizes = [8, 128], strides = [1, 1]} : vector<8x512xf32> to vector<8x128xf32>
    %cst_76 = arith.constant 5.000000e-01 : f32
    %242 = vector.broadcast %cst_76 : f32 to vector<8x128xf32>
    %243 = arith.mulf %242, %241 : vector<8x128xf32>
    %244 = math.tanh %243 : vector<8x128xf32>
    %cst_77 = arith.constant 5.000000e-01 : f32
    %245 = vector.broadcast %cst_77 : f32 to vector<8x128xf32>
    %246 = arith.mulf %245, %244 : vector<8x128xf32>
    %cst_78 = arith.constant 5.000000e-01 : f32
    %247 = vector.broadcast %cst_78 : f32 to vector<8x128xf32>
    %248 = arith.addf %246, %247 : vector<8x128xf32>
    %249 = arith.mulf %238, %216 : vector<8x128xf32>
    %250 = arith.mulf %230, %240 : vector<8x128xf32>
    %251 = arith.addf %249, %250 : vector<8x128xf32>
    %252 = math.tanh %251 : vector<8x128xf32>
    %253 = arith.mulf %248, %252 : vector<8x128xf32>
    %254 = vector.extract_strided_slice %5 {offsets = [56, 0], sizes = [8, 512], strides = [1, 1]} : vector<64x512xf32> to vector<8x512xf32>
    %255 = arith.truncf %253 : vector<8x128xf32> to vector<8x128xbf16>
    %cst_79 = arith.constant dense<0.000000e+00> : vector<8x512xf32>
    %256 = tpu.matmul %255, %6, %cst_79 {dimension_numbers = #tpu.dot_dimension_numbers<[1], [0], [0], [1], [0, 0, 1, 1], [], []>} : vector<8x128xbf16>, vector<128x512xbf16>, vector<8x512xf32> -> vector<8x512xf32>
    %257 = arith.addf %254, %256 : vector<8x512xf32>
    %258 = vector.extract_strided_slice %257 {offsets = [0, 0], sizes = [8, 128], strides = [1, 1]} : vector<8x512xf32> to vector<8x128xf32>
    %cst_80 = arith.constant 5.000000e-01 : f32
    %259 = vector.broadcast %cst_80 : f32 to vector<8x128xf32>
    %260 = arith.mulf %259, %258 : vector<8x128xf32>
    %261 = math.tanh %260 : vector<8x128xf32>
    %cst_81 = arith.constant 5.000000e-01 : f32
    %262 = vector.broadcast %cst_81 : f32 to vector<8x128xf32>
    %263 = arith.mulf %262, %261 : vector<8x128xf32>
    %cst_82 = arith.constant 5.000000e-01 : f32
    %264 = vector.broadcast %cst_82 : f32 to vector<8x128xf32>
    %265 = arith.addf %263, %264 : vector<8x128xf32>
    %266 = vector.extract_strided_slice %257 {offsets = [0, 128], sizes = [8, 128], strides = [1, 1]} : vector<8x512xf32> to vector<8x128xf32>
    %cst_83 = arith.constant 5.000000e-01 : f32
    %267 = vector.broadcast %cst_83 : f32 to vector<8x128xf32>
    %268 = arith.mulf %267, %266 : vector<8x128xf32>
    %269 = math.tanh %268 : vector<8x128xf32>
    %cst_84 = arith.constant 5.000000e-01 : f32
    %270 = vector.broadcast %cst_84 : f32 to vector<8x128xf32>
    %271 = arith.mulf %270, %269 : vector<8x128xf32>
    %cst_85 = arith.constant 5.000000e-01 : f32
    %272 = vector.broadcast %cst_85 : f32 to vector<8x128xf32>
    %273 = arith.addf %271, %272 : vector<8x128xf32>
    %274 = vector.extract_strided_slice %257 {offsets = [0, 256], sizes = [8, 128], strides = [1, 1]} : vector<8x512xf32> to vector<8x128xf32>
    %275 = math.tanh %274 : vector<8x128xf32>
    %276 = vector.extract_strided_slice %257 {offsets = [0, 384], sizes = [8, 128], strides = [1, 1]} : vector<8x512xf32> to vector<8x128xf32>
    %cst_86 = arith.constant 5.000000e-01 : f32
    %277 = vector.broadcast %cst_86 : f32 to vector<8x128xf32>
    %278 = arith.mulf %277, %276 : vector<8x128xf32>
    %279 = math.tanh %278 : vector<8x128xf32>
    %cst_87 = arith.constant 5.000000e-01 : f32
    %280 = vector.broadcast %cst_87 : f32 to vector<8x128xf32>
    %281 = arith.mulf %280, %279 : vector<8x128xf32>
    %cst_88 = arith.constant 5.000000e-01 : f32
    %282 = vector.broadcast %cst_88 : f32 to vector<8x128xf32>
    %283 = arith.addf %281, %282 : vector<8x128xf32>
    %284 = arith.mulf %273, %251 : vector<8x128xf32>
    %285 = arith.mulf %265, %275 : vector<8x128xf32>
    %286 = arith.addf %284, %285 : vector<8x128xf32>
    %287 = math.tanh %286 : vector<8x128xf32>
    %288 = arith.mulf %283, %287 : vector<8x128xf32>
    %289 = arith.truncf %288 : vector<8x128xf32> to vector<8x128xbf16>
    %c0_89 = arith.constant 0 : index
    %c0_90 = arith.constant 0 : index
    %290 = vector.load %arg4[%c0_89, %c0_90] : memref<128x128xbf16, #tpu.memory_space<vmem>>, vector<128x128xbf16>
    %cst_91 = arith.constant dense<0.000000e+00> : vector<8x128xf32>
    %291 = tpu.matmul %289, %290, %cst_91 {dimension_numbers = #tpu.dot_dimension_numbers<[1], [0], [0], [1], [0, 0, 1, 1], [], []>} : vector<8x128xbf16>, vector<128x128xbf16>, vector<8x128xf32> -> vector<8x128xf32>
    %c0_92 = arith.constant 0 : index
    %c0_93 = arith.constant 0 : index
    %292 = vector.load %arg5[%c0_92, %c0_93] : memref<1x128xf32, #tpu.memory_space<vmem>>, vector<1x128xf32>
    %293 = vector.broadcast %292 : vector<1x128xf32> to vector<8x128xf32>
    %294 = arith.addf %291, %293 : vector<8x128xf32>
    %c0_94 = arith.constant 0 : index
    %c0_95 = arith.constant 0 : index
    %295 = vector.load %arg6[%c0_94, %c0_95] : memref<8x128xf32, #tpu.memory_space<vmem>>, vector<8x128xf32>
    tpu.vector_store %arg6[%c0_94, %c0_95], %294 {strides = array<i32>} : memref<8x128xf32, #tpu.memory_space<vmem>>, vector<8x128xf32>,
    return
  }
}

</mosaic_0001>

<bundles_post_ra>
// kernel: tpu_custom_call.1
= control target key start
LH: loop header
LB: loop body
LE: loop exit
PB: predicated region body
PF: predicated region fallthrough
CT: control target
= control target key end

     0   :  { %11 = vsyncpa [#allocation3], 0  ;;  %s2142_s0 = inlined_call_operand.vmem [shape: bf16[64,16], index: 0, kind: input, shape index: {}]   ;;  %s2143_s1 = inlined_call_operand.vmem [shape: bf16[16,512], index: 1, kind: input, shape index: {}]   ;;  %s2144_s2 = inlined_call_operand.hbm [shape: bf16[128,512], index: 2, kind: input, shape index: {}]   ;;  %s2145_s3 = inlined_call_operand.vmem [shape: f32[1,512], index: 3, kind: input, shape index: {}]   ;;  %s2146_s4 = inlined_call_operand.hbm [shape: bf16[128,128], index: 4, kind: input, shape index: {}]   ;;  %s2147_s5 = inlined_call_operand.vmem [shape: f32[1,128], index: 5, kind: input, shape index: {}]   ;;  %s2148_s6 = inlined_call_operand.hbm [shape: f32[8,128], index: 6, kind: output, shape index: {}]  }
   0x1   :  { %12 = vsyncpa [#allocation6], 0 }
   0x2   :  { %13 = vsyncpa [#allocation4], 0  ;;  %s22_s23 = sshll.u32 %s2144_s2, 4  ;;  %s1564_s24 = smov [#allocation2]   ;;  %s23_s23 = int_to_ptr.hbm [resolvable:$true] %s22_s23 }
   0x3   :  { %s24_s25 = sshll.u32 %s1564_s24, 4  ;;  %s37_s28 = sshll.u32 %s2146_s4, 4  ;;  %s25_s25 = int_to_ptr.vmem [resolvable:$true] %s24_s25  ;;  %s38_s28 = int_to_ptr.hbm [resolvable:$true] %s37_s28 }
   0x4   :  { %s1565_s29 = smov 256   ;;  %s1566_s30 = smov 16  }
   0x5   :  { %30 = dma.hbm_to_vmem [thread:$0]  %s23_s23, 4096, %s25_s25, [#allocation3], %s1565_s29, %s1565_s29, %s1566_s30  }
   0x6   :  { %s1567_s7 = smov [#allocation5]   ;;  %s1568_s9 = smov 64  }
   0x7   :  { %s39_s8 = sshll.u32 %s1567_s7, 4  ;;  %s1569_s10 = smov 4   ;;  %s40_s8 = int_to_ptr.vmem [resolvable:$true] %s39_s8 }
   0x8   :  { %45 = dma.hbm_to_vmem [thread:$0]  %s38_s28, 1024, %s40_s8, [#allocation6], %s1568_s9, %s1568_s9, %s1569_s10  }
   0x9   :  { %1558 = dma.done.wait [#allocation3], 4096  }
   0xa   :  { %1559 = vsyncadd [#allocation3], 4294963200 }
   0xb   :  { %1560 = dma.done.wait [#allocation6], 1024  }
   0xc   :  { %1561 = vsyncadd [#allocation6], 4294966272  ;;  %v1158_v0 = vld [vmem:[%s2143_s1] sm:$0xf]  ;;  %v1354_v1 = vld [vmem:[%s2143_s1 + $0xc] sm:$0xf0] }
   0xd   :  { %v1166_v2 = vld [vmem:[%s2143_s1 + $0x8] sm:$0xf]  ;;  %v1159_v3 = vor.u32 %v1354_v1, %v1158_v0  ;;  %v1355_v4 = vld [vmem:[%s2143_s1 + $0x14] sm:$0xf0]  ;;  %v1353_v5 = vld [vmem:[%s2143_s1 + $0xc] sm:$0xf] }
   0xe   :  { %v1168_v6 = vld [vmem:[%s2143_s1 + $0x18] sm:$0xf0]  ;;  %v1167_v7 = vor.u32 %v1355_v4, %v1166_v2  ;;  %v1634_v9 = vld [vmem:[%s2142_s0] sm:$0xff]  ;;  %vm119_vm0 = vcmask 130048   ;;  %v1160_v12 = vld [vmem:[%s2143_s1 + $0x10] sm:$0xf0] }
   0xf   :  { %v1171_v8 = vor.u32 %v1353_v5, %v1168_v6  ;;  %v1639_v10 = vld [vmem:[%s2142_s0 + $0x18] sm:$0xff]  ;;  %v1352_v11 = vld [vmem:[%s2143_s1 + $0x4] sm:$0xf]  ;;  %139 = vmatpush.bf16.msra.mxu0 %v1159_v3  ;;  %1396 = vmatpush.bf16.msra.mxu1 %v1159_v3  ;;  %v1304_v15 = vld [vmem:[#allocation2 + $0xf0] sm:$0xf0]  ;;  %s1571_s10 = smov [#allocation7]  }
  0x10   :  { %v1384_v13 = vld [vmem:[#allocation2 + $0xe4] sm:$0xf]  ;;  %197 = vmatpush.bf16.msra.mxu2 %v1167_v7  ;;  %v1163_v14 = vor.u32 %v1352_v11, %v1160_v12  ;;  %v1310_v16 = vld [vmem:[#allocation2 + $0xe8] sm:$0xf]  ;;  %v1387_v17 = vld [vmem:[#allocation2 + $0xf4] sm:$0xf0] }
  0x11   :  { %226 = vmatpush.bf16.msra.mxu3 %v1171_v8  ;;  %v1647_v18 = vor.u32 %v1384_v13, %v1304_v15  ;;  %v1649_v19 = vor.u32 %v1387_v17, %v1310_v16  ;;  %v1302_v20 = vld [vmem:[#allocation2 + $0xe0] sm:$0xf]  ;;  %v1386_v21 = vld [vmem:[#allocation2 + $0xec] sm:$0xf0]  ;;  %v1385_v25 = vld [vmem:[#allocation2 + $0xec] sm:$0xf] }
  0x12   :  { %v1286_v22 = vld [vmem:[#allocation2 + $0xc0] sm:$0xf]  ;;  %1172 = vmatmul.msk.bf16.vlgmr.msra.gmra.mxu0 %vm119_vm0, %v1634_v9  ;;  %1175 = vmatmul.msk.bf16.vlgmr.msra.gmra.mxu1 %vm119_vm0, %v1639_v10  ;;  %v1655_v23 = vor.u32 %v1386_v21, %v1302_v20  ;;  %v1382_v24 = vld [vmem:[#allocation2 + $0xcc] sm:$0xf0]  ;;  %v1312_v26 = vld [vmem:[#allocation2 + $0xf8] sm:$0xf0] }
  0x13   :  { %168 = vmatpush.bf16.msrb.mxu1 %v1163_v14  ;;  %1180 = vmatmul.msk.bf16.vlgmr.msra.gmra.mxu2 %vm119_vm0, %v1634_v9  ;;  %v1659_v27 = vor.u32 %v1385_v25, %v1312_v26  ;;  %v1380_v28 = vld [vmem:[#allocation2 + $0xc4] sm:$0xf]  ;;  %v1288_v29 = vld [vmem:[#allocation2 + $0xd0] sm:$0xf0]  ;;  %v1294_v30 = vld [vmem:[#allocation2 + $0xc8] sm:$0xf]  ;;  %v1668_v33 = vor.u32 %v1382_v24, %v1286_v22 }
  0x14   :  { %1184 = vmatmul.msk.bf16.vlgmr.msra.gmra.mxu3 %vm119_vm0, %v1634_v9  ;;  %v1664_v31 = vor.u32 %v1380_v28, %v1288_v29  ;;  %v1383_v32 = vld [vmem:[#allocation2 + $0xd4] sm:$0xf0]  ;;  %466 = vmatpush.bf16.msrb.mxu2 %v1649_v19  ;;  %v1270_v35 = vld [vmem:[#allocation2 + $0xa0] sm:$0xf]  ;;  %v1381_v36 = vld [vmem:[#allocation2 + $0xcc] sm:$0xf] }
  0x15   :  { %440 = vmatpush.bf16.msrb.mxu0 %v1655_v23  ;;  %v1670_v34 = vor.u32 %v1383_v32, %v1294_v30  ;;  %479 = vmatpush.bf16.msrb.mxu3 %v1659_v27  ;;  %v1378_v37 = vld [vmem:[#allocation2 + $0xac] sm:$0xf0]  ;;  %v1296_v38 = vld [vmem:[#allocation2 + $0xd8] sm:$0xf0]  ;;  %v1376_v39 = vld [vmem:[#allocation2 + $0xa4] sm:$0xf] }
  0x16   :  { %v1673_v40 = vor.u32 %v1381_v36, %v1296_v38  ;;  %v1272_v41 = vld [vmem:[#allocation2 + $0xb0] sm:$0xf0]  ;;  %v1278_v42 = vld [vmem:[#allocation2 + $0xa8] sm:$0xf]  ;;  %v1379_v43 = vld [vmem:[#allocation2 + $0xb4] sm:$0xf0]  ;;  %v1680_v46 = vor.u32 %v1378_v37, %v1270_v35 }
  0x17   :  { %453 = vmatpush.bf16.msra.mxu1 %v1647_v18  ;;  %v1254_v44 = vld [vmem:[#allocation2 + $0x80] sm:$0xf]  ;;  %v1676_v45 = vor.u32 %v1376_v39, %v1272_v41  ;;  %v1374_v47 = vld [vmem:[#allocation2 + $0x8c] sm:$0xf0]  ;;  %v1682_v48 = vor.u32 %v1379_v43, %v1278_v42  ;;  %v1377_v49 = vld [vmem:[#allocation2 + $0xac] sm:$0xf] }
  0x18   :  { %467 = vmatpush.bf16.msrb.mxu2 %v1670_v34  ;;  %v1280_v50 = vld [vmem:[#allocation2 + $0xb8] sm:$0xf0]  ;;  %v1372_v52 = vld [vmem:[#allocation2 + $0x84] sm:$0xf]  ;;  %v1256_v53 = vld [vmem:[#allocation2 + $0x90] sm:$0xf0]  ;;  %v1691_v58 = vor.u32 %v1374_v47, %v1254_v44 }
  0x19   :  { %441 = vmatpush.bf16.msrb.mxu0 %v1668_v33  ;;  %480 = vmatpush.bf16.msrb.mxu3 %v1673_v40  ;;  %v1685_v51 = vor.u32 %v1377_v49, %v1280_v50  ;;  %v1262_v54 = vld [vmem:[#allocation2 + $0x88] sm:$0xf]  ;;  %v1375_v55 = vld [vmem:[#allocation2 + $0x94] sm:$0xf0]  ;;  %v1688_v56 = vor.u32 %v1372_v52, %v1256_v53  ;;  %v1373_v57 = vld [vmem:[#allocation2 + $0x8c] sm:$0xf] }
  0x1a   :  { %v1694_v59 = vor.u32 %v1375_v55, %v1262_v54  ;;  %v1264_v60 = vld [vmem:[#allocation2 + $0x98] sm:$0xf0]  ;;  %v1699_v61 = vld [vmem:[%s2142_s0 + $0x8] sm:$0xff]  ;;  %v1238_v62 = vld [vmem:[#allocation2 + $0x60] sm:$0xf]  ;;  %s1127_s2 = sshll.u32 %s1571_s10, 4  ;;  %s1128_s2 = int_to_ptr.vmem [resolvable:$true] %s1127_s2 }
  0x1b   :  { %454 = vmatpush.bf16.msra.mxu1 %v1664_v31  ;;  %v1370_v63 = vld [vmem:[#allocation2 + $0x6c] sm:$0xf0]  ;;  %v1702_v0 = vor.u32 %v1373_v57, %v1264_v60  ;;  %v1222_v2 = vld [vmem:[#allocation2 + $0x40] sm:$0xf]  ;;  %v1246_v4 = vld [vmem:[#allocation2 + $0x68] sm:$0xf] }
  0x1c   :  { %468 = vmatpush.bf16.msrb.mxu2 %v1682_v48  ;;  %v1706_v1 = vor.u32 %v1370_v63, %v1238_v62  ;;  %v1366_v3 = vld [vmem:[#allocation2 + $0x4c] sm:$0xf0]  ;;  %v1371_v5 = vld [vmem:[#allocation2 + $0x74] sm:$0xf0]  ;;  %v1369_v6 = vld [vmem:[#allocation2 + $0x6c] sm:$0xf] }
  0x1d   :  { %442 = vmatpush.bf16.msrb.mxu0 %v1680_v46  ;;  %481 = vmatpush.bf16.msrb.mxu3 %v1685_v51  ;;  %v1716_v7 = vor.u32 %v1371_v5, %v1246_v4  ;;  %v1248_v8 = vld [vmem:[#allocation2 + $0x78] sm:$0xf0]  ;;  %v1206_v11 = vld [vmem:[#allocation2 + $0x20] sm:$0xf]  ;;  %v1362_v12 = vld [vmem:[#allocation2 + $0x2c] sm:$0xf0]  ;;  %v1723_v16 = vor.u32 %v1366_v3, %v1222_v2 }
  0x1e   :  { %v1368_v13 = vld [vmem:[#allocation2 + $0x64] sm:$0xf]  ;;  %v1240_v14 = vld [vmem:[#allocation2 + $0x70] sm:$0xf0]  ;;  %v1720_v15 = vor.u32 %v1369_v6, %v1248_v8  ;;  %v1367_v20 = vld [vmem:[#allocation2 + $0x54] sm:$0xf0]  ;;  %v1737_v37 = vor.u32 %v1362_v12, %v1206_v11 }
  0x1f   :  { %455 = vmatpush.bf16.msra.mxu1 %v1676_v45  ;;  %v1725_v17 = vor.u32 %v1368_v13, %v1240_v14  ;;  %v1365_v21 = vld [vmem:[#allocation2 + $0x4c] sm:$0xf]  ;;  %v1232_v22 = vld [vmem:[#allocation2 + $0x58] sm:$0xf0]  ;;  %v1364_v25 = vld [vmem:[#allocation2 + $0x44] sm:$0xf] }
  0x20   :  { %469 = vmatpush.bf16.msrb.mxu2 %v1694_v59  ;;  %v1224_v26 = vld [vmem:[#allocation2 + $0x50] sm:$0xf0]  ;;  %v1214_v28 = vld [vmem:[#allocation2 + $0x28] sm:$0xf]  ;;  %v1732_v29 = vor.u32 %v1365_v21, %v1232_v22  ;;  %v1363_v32 = vld [vmem:[#allocation2 + $0x34] sm:$0xf0] }
  0x21   :  { %443 = vmatpush.bf16.msrb.mxu0 %v1691_v58  ;;  %482 = vmatpush.bf16.msrb.mxu3 %v1702_v0  ;;  %v1734_v30 = vor.u32 %v1364_v25, %v1224_v26  ;;  %v1361_v35 = vld [vmem:[#allocation2 + $0x2c] sm:$0xf]  ;;  %v1216_v36 = vld [vmem:[#allocation2 + $0x38] sm:$0xf0]  ;;  %v1190_v38 = vld [vmem:[#allocation2] sm:$0xf]  ;;  %v1740_v39 = vor.u32 %v1363_v32, %v1214_v28 }
  0x22   :  { %1173 = vmatmul.msk.bf16.gmra.mxu0 %vm119_vm0, %v1699_v61  ;;  %1176 = vmatmul.msk.bf16.vlgmr.msrb.gmra.mxu1 %vm119_vm0, %v1634_v9  ;;  %v1230_v9 = vld [vmem:[#allocation2 + $0x48] sm:$0xf]  ;;  %v1358_v41 = vld [vmem:[#allocation2 + $0xc] sm:$0xf0]  ;;  %v1359_v43 = vld [vmem:[#allocation2 + $0x14] sm:$0xf0]  ;;  %v1744_v44 = vor.u32 %v1361_v35, %v1216_v36 }
  0x23   :  { %456 = vmatpush.bf16.msra.mxu1 %v1688_v56  ;;  %1181 = vmatmul.msk.bf16.gmra.mxu2 %vm119_vm0, %v1699_v61  ;;  %v1728_v24 = vor.u32 %v1367_v20, %v1230_v9  ;;  %v1198_v42 = vld [vmem:[#allocation2 + $0x8] sm:$0xf]  ;;  %v1357_v47 = vld [vmem:[#allocation2 + $0xc] sm:$0xf]  ;;  %v1200_v49 = vld [vmem:[#allocation2 + $0x18] sm:$0xf0]  ;;  %v1747_v50 = vor.u32 %v1358_v41, %v1190_v38 }
  0x24   :  { %1185 = vmatmul.msk.bf16.gmra.mxu3 %vm119_vm0, %v1699_v61  ;;  %470 = vmatpush.bf16.msrb.mxu2 %v1716_v7  ;;  %v1750_v52 = vor.u32 %v1359_v43, %v1198_v42  ;;  %v1350_v53 = vld [vmem:[%s2142_s0 + $0x10] sm:$0xff]  ;;  %v1756_v54 = vor.u32 %v1357_v47, %v1200_v49  ;;  %v1360_v55 = vld [vmem:[#allocation2 + $0x24] sm:$0xf]  ;;  %s1129_s4 = sshll.u32 %s2148_s6, 4  ;;  %s1130_s4 = int_to_ptr.hbm [resolvable:$true] %s1129_s4 }
  0x25   :  { %444 = vmatpush.bf16.msrb.mxu0 %v1706_v1  ;;  %483 = vmatpush.bf16.msrb.mxu3 %v1720_v15  ;;  %v1208_v57 = vld [vmem:[#allocation2 + $0x30] sm:$0xf0]  ;;  %v1356_v62 = vld [vmem:[#allocation2 + $0x4] sm:$0xf] }
  0x26   :  { %v1765_v60 = vor.u32 %v1360_v55, %v1208_v57  ;;  %v1192_v63 = vld [vmem:[#allocation2 + $0x10] sm:$0xf0] }
  0x27   :  { %457 = vmatpush.bf16.msra.mxu1 %v1725_v17  ;;  %v1770_v2 = vor.u32 %v1356_v62, %v1192_v63 }
  0x28   :  { %471 = vmatpush.bf16.msrb.mxu2 %v1728_v24 }
  0x29   :  { %445 = vmatpush.bf16.msrb.mxu0 %v1723_v16  ;;  %484 = vmatpush.bf16.msrb.mxu3 %v1732_v29 }
  0x2b   :  { %458 = vmatpush.bf16.msra.mxu1 %v1734_v30 }
  0x2c   :  { %472 = vmatpush.bf16.msrb.mxu2 %v1740_v39 }
  0x2d   :  { %446 = vmatpush.bf16.msrb.mxu0 %v1737_v37  ;;  %485 = vmatpush.bf16.msrb.mxu3 %v1744_v44 }
  0x2f   :  { %459 = vmatpush.bf16.msra.mxu1 %v1765_v60 }
  0x30   :  { %473 = vmatpush.bf16.msrb.mxu2 %v1750_v52 }
  0x31   :  { %447 = vmatpush.bf16.msrb.mxu0 %v1747_v50  ;;  %486 = vmatpush.bf16.msrb.mxu3 %v1756_v54 }
  0x32   :  { %1174 = vmatmul.msk.bf16.gmra.mxu0 %vm119_vm0, %v1350_v53  ;;  %1177 = vmatmul.msk.bf16.gmra.mxu1 %vm119_vm0, %v1699_v61  ;;  %v1570_v61 = vmov 0  }
  0x33   :  { %1182 = vmatmul.msk.bf16.gmra.mxu2 %vm119_vm0, %v1350_v53  ;;  %460 = vmatpush.bf16.msra.mxu1 %v1770_v2 }
  0x34   :  { %1186 = vmatmul.msk.bf16.gmra.mxu3 %vm119_vm0, %v1350_v53  ;;  %541 = vmatpush.bf16.msra.mxu2 %v1649_v19 }
  0x35   :  { %515 = vmatpush.bf16.msra.mxu0 %v1655_v23  ;;  %554 = vmatpush.bf16.msra.mxu3 %v1659_v27 }
  0x37   :  { %528 = vmatpush.bf16.msrb.mxu1 %v1647_v18 }
  0x38   :  { %542 = vmatpush.bf16.msra.mxu2 %v1670_v34 }
  0x39   :  { %516 = vmatpush.bf16.msra.mxu0 %v1668_v33  ;;  %555 = vmatpush.bf16.msra.mxu3 %v1673_v40 }
  0x3b   :  { %529 = vmatpush.bf16.msrb.mxu1 %v1664_v31 }
  0x3c   :  { %543 = vmatpush.bf16.msra.mxu2 %v1682_v48 }
  0x3d   :  { %517 = vmatpush.bf16.msra.mxu0 %v1680_v46  ;;  %556 = vmatpush.bf16.msra.mxu3 %v1685_v51 }
  0x3f   :  { %530 = vmatpush.bf16.msrb.mxu1 %v1676_v45 }
  0x40   :  { %544 = vmatpush.bf16.msra.mxu2 %v1694_v59 }
  0x41   :  { %518 = vmatpush.bf16.msra.mxu0 %v1691_v58  ;;  %557 = vmatpush.bf16.msra.mxu3 %v1702_v0 }
  0x42   :  { %1178 = vmatmul.msk.bf16.gmra.mxu1 %vm119_vm0, %v1350_v53  ;;  %448 = vmatmul.bf16.vlgmr.msrb.gmra.mxu0 %v1570_v61 }
  0x43   :  { %1183 = vmatmul.msk.bf16.gmra.mxu2 %vm119_vm0, %v1639_v10  ;;  %531 = vmatpush.bf16.msrb.mxu1 %v1688_v56 }
  0x44   :  { %1187 = vmatmul.msk.bf16.gmra.mxu3 %vm119_vm0, %v1639_v10  ;;  %545 = vmatpush.bf16.msra.mxu2 %v1716_v7 }
  0x45   :  { %519 = vmatpush.bf16.msra.mxu0 %v1706_v1  ;;  %558 = vmatpush.bf16.msra.mxu3 %v1720_v15 }
  0x47   :  { %532 = vmatpush.bf16.msrb.mxu1 %v1725_v17 }
  0x48   :  { %546 = vmatpush.bf16.msra.mxu2 %v1728_v24 }
  0x49   :  { %520 = vmatpush.bf16.msra.mxu0 %v1723_v16  ;;  %559 = vmatpush.bf16.msra.mxu3 %v1732_v29 }
  0x4b   :  { %533 = vmatpush.bf16.msrb.mxu1 %v1734_v30 }
  0x4c   :  { %547 = vmatpush.bf16.msra.mxu2 %v1740_v39 }
  0x4d   :  { %521 = vmatpush.bf16.msra.mxu0 %v1737_v37  ;;  %560 = vmatpush.bf16.msra.mxu3 %v1744_v44 }
  0x4f   :  { %534 = vmatpush.bf16.msrb.mxu1 %v1765_v60 }
  0x50   :  { %548 = vmatpush.bf16.msra.mxu2 %v1750_v52 }
  0x51   :  { %522 = vmatpush.bf16.msra.mxu0 %v1747_v50  ;;  %561 = vmatpush.bf16.msra.mxu3 %v1756_v54 }
  0x52   :  { %1179 = vmatmul.msk.bf16.gmra.mxu1 %vm119_vm0, %v1639_v10  ;;  %v69_v10 = vld [vmem:[%s2145_s3] sm:$0xf] }
  0x53   :  { %474 = vmatmul.bf16.vlgmr.msrb.gmra.mxu2 %v1570_v61  ;;  %535 = vmatpush.bf16.msrb.mxu1 %v1770_v2  ;;  %v1846_v3 = vperm.slane %v69_v10, 0  ;;  %v73_v9 = vperm.slane %v69_v10, 2  ;;  %v1860_v20 = vperm.slane %v69_v10, 3  ;;  %v72_v38 = vperm.slane %v69_v10, 1 }
  0x54   :  { %487 = vmatmul.bf16.vlgmr.msrb.gmra.mxu3 %v1570_v61  ;;  %616 = vmatpush.bf16.msrb.mxu2 %v1649_v19 }
  0x55   :  { %590 = vmatpush.bf16.msrb.mxu0 %v1655_v23  ;;  %629 = vmatpush.bf16.msrb.mxu3 %v1659_v27  ;;  %2150 = vst [vmem:[#allocation11_spill] sm:$0xff] %v1846_v3 }
  0x58   :  { %617 = vmatpush.bf16.msrb.mxu2 %v1670_v34 }
  0x59   :  { %591 = vmatpush.bf16.msrb.mxu0 %v1668_v33  ;;  %630 = vmatpush.bf16.msrb.mxu3 %v1673_v40 }
  0x5c   :  { %618 = vmatpush.bf16.msrb.mxu2 %v1682_v48 }
  0x5d   :  { %592 = vmatpush.bf16.msrb.mxu0 %v1680_v46  ;;  %631 = vmatpush.bf16.msrb.mxu3 %v1685_v51 }
  0x60   :  { %619 = vmatpush.bf16.msrb.mxu2 %v1694_v59 }
  0x61   :  { %593 = vmatpush.bf16.msrb.mxu0 %v1691_v58  ;;  %632 = vmatpush.bf16.msrb.mxu3 %v1702_v0 }
  0x62   :  { %461 = vmatmul.bf16.vlgmr.msra.gmra.mxu1 %v1570_v61 }
  0x63   :  { %603 = vmatpush.bf16.msra.mxu1 %v1647_v18 }
  0x64   :  { %620 = vmatpush.bf16.msrb.mxu2 %v1716_v7 }
  0x65   :  { %594 = vmatpush.bf16.msrb.mxu0 %v1706_v1  ;;  %633 = vmatpush.bf16.msrb.mxu3 %v1720_v15 }
  0x67   :  { %604 = vmatpush.bf16.msra.mxu1 %v1664_v31 }
  0x68   :  { %621 = vmatpush.bf16.msrb.mxu2 %v1728_v24 }
  0x69   :  { %595 = vmatpush.bf16.msrb.mxu0 %v1723_v16  ;;  %634 = vmatpush.bf16.msrb.mxu3 %v1732_v29 }
  0x6b   :  { %605 = vmatpush.bf16.msra.mxu1 %v1676_v45 }
  0x6c   :  { %622 = vmatpush.bf16.msrb.mxu2 %v1740_v39 }
  0x6d   :  { %596 = vmatpush.bf16.msrb.mxu0 %v1737_v37  ;;  %635 = vmatpush.bf16.msrb.mxu3 %v1744_v44 }
  0x6f   :  { %606 = vmatpush.bf16.msra.mxu1 %v1688_v56 }
  0x70   :  { %623 = vmatpush.bf16.msrb.mxu2 %v1750_v52 }
  0x71   :  { %597 = vmatpush.bf16.msrb.mxu0 %v1747_v50  ;;  %636 = vmatpush.bf16.msrb.mxu3 %v1756_v54 }
  0x73   :  { %607 = vmatpush.bf16.msra.mxu1 %v1725_v17 }
  0x77   :  { %608 = vmatpush.bf16.msra.mxu1 %v1734_v30 }
  0x7b   :  { %609 = vmatpush.bf16.msra.mxu1 %v1765_v60 }
  0x7f   :  { %610 = vmatpush.bf16.msra.mxu1 %v1770_v2 }
  0x8f   :  { %v141_v4 = vpop.f32.mrf.mxu0  ;;  %v156_v5 = vpop.f32.mrf.mxu1 }
  0x90   :  { %v1849_v6 = vadd.f32 %v156_v5, %v1846_v3 }
  0x92   :  { %2151 = vst [vmem:[#allocation12_spill] sm:$0xff] %v1849_v6 }
  0x96   :  { %v1851_v8 = vpop.f32.mrf.mxu2 }
  0x97   :  { %v1853_v11 = vpop.f32.mrf.mxu3  ;;  %v143_v12 = vpop.f32.mrf.mxu0 }
  0x98   :  { %v1856_v13 = vadd.f32 %v143_v12, %v1846_v3  ;;  %v1858_v14 = vpop.f32.mrf.mxu1 }
  0x99   :  { %2152 = vst [vmem:[#allocation13_spill] sm:$0xff] %v1858_v14 }
  0x9e   :  { %v201_v21 = vpop.f32.mrf.mxu2 }
  0x9f   :  { %v1862_v22 = vadd.f32 %v201_v21, %v73_v9  ;;  %v230_v25 = vpop.f32.mrf.mxu3  ;;  %v146_v26 = vpop.f32.mrf.mxu0 }
  0xa0   :  { %v1865_v28 = vadd.f32 %v230_v25, %v1860_v20  ;;  %v1868_v32 = vadd.f32 %v146_v26, %v1846_v3  ;;  %v170_v35 = vpop.f32.mrf.mxu1 }
  0xa6   :  { %v204_v36 = vpop.f32.mrf.mxu2 }
  0xa7   :  { %v1870_v41 = vadd.f32 %v204_v36, %v73_v9  ;;  %v233_v42 = vpop.f32.mrf.mxu3  ;;  %v148_v43 = vpop.f32.mrf.mxu0 }
  0xa8   :  { %v1873_v47 = vadd.f32 %v233_v42, %v1860_v20  ;;  %v1876_v49 = vadd.f32 %v148_v43, %v1846_v3  ;;  %v172_v53 = vpop.f32.mrf.mxu1 }
  0xa9   :  { %v1878_v55 = vadd.f32 %v172_v53, %v72_v38 }
  0xae   :  { %v206_v57 = vpop.f32.mrf.mxu2 }
  0xaf   :  { %v1880_v62 = vadd.f32 %v206_v57, %v73_v9  ;;  %v235_v63 = vpop.f32.mrf.mxu3  ;;  %v151_v61 = vpop.f32.mrf.mxu0 }
  0xb0   :  { %v1883_v10 = vadd.f32 %v235_v63, %v1860_v20  ;;  %v1886_v5 = vadd.f32 %v151_v61, %v1846_v3  ;;  %v175_v12 = vpop.f32.mrf.mxu1 }
  0xb1   :  { %2153 = vst [vmem:[#allocation14_spill] sm:$0xff] %v1880_v62  ;;  %v1888_v21 = vadd.f32 %v175_v12, %v72_v38 }
  0xb2   :  { %2154 = vst [vmem:[#allocation15_spill] sm:$0xff] %v1883_v10 }
  0xb3   :  { %2155 = vst [vmem:[#allocation16_spill] sm:$0xff] %v1886_v5 }
  0xb6   :  { %v209_v25 = vpop.f32.mrf.mxu2 }
  0xb7   :  { %v1890_v26 = vadd.f32 %v209_v25, %v73_v9  ;;  %v238_v36 = vpop.f32.mrf.mxu3  ;;  %v153_v42 = vpop.f32.mrf.mxu0 }
  0xb8   :  { %v1893_v43 = vadd.f32 %v238_v36, %v1860_v20  ;;  %v1896_v53 = vadd.f32 %v153_v42, %v1846_v3  ;;  %v177_v57 = vpop.f32.mrf.mxu1  ;;  %v142_v36 = vadd.f32 %v141_v4, %v1846_v3 }
  0xb9   :  { %2156 = vst [vmem:[#allocation17_spill] sm:$0xff] %v1890_v26  ;;  %v1898_v63 = vadd.f32 %v177_v57, %v72_v38 }
  0xba   :  { %2157 = vst [vmem:[#allocation18_spill] sm:$0xff] %v1893_v43 }
  0xbb   :  { %2158 = vst [vmem:[#allocation19_spill] sm:$0xff] %v1896_v53 }
  0xbc   :  { %2159 = vst [vmem:[#allocation20_spill] sm:$0xff] %v1898_v63 }
  0xbe   :  { %v211_v14 = vpop.f32.mrf.mxu2 }
  0xbf   :  { %v1900_v61 = vadd.f32 %v211_v14, %v73_v9  ;;  %v240_v6 = vpop.f32.mrf.mxu3  ;;  %v449_v12 = vpop.f32.mrf.mxu0 }
  0xc0   :  { %v1903_v5 = vadd.f32 %v240_v6, %v1860_v20  ;;  %v180_v25 = vpop.f32.mrf.mxu1 }
  0xc1   :  { %2160 = vst [vmem:[#allocation21_spill] sm:$0xff] %v1900_v61  ;;  %v1905_v26 = vadd.f32 %v180_v25, %v72_v38  ;;  %v492_v61 = vadd.f32 %v449_v12, %v142_v36 }
  0xc2   :  { %2161 = vst [vmem:[#allocation22_spill] sm:$0xff] %v1903_v5 }
  0xc3   :  { %2162 = vst [vmem:[#allocation23_spill] sm:$0xff] %v1905_v26  ;;  %v496_v63 = vmul.f32 0.5, %v492_v61 }
  0xc5   :  { %1406 = vtanh.f32 %v496_v63 }
  0xc6   :  { %v214_v10 = vpop.f32.mrf.mxu2 }
  0xc7   :  { %v1908_v43 = vadd.f32 %v214_v10, %v73_v9  ;;  %v243_v42 = vpop.f32.mrf.mxu3  ;;  %v451_v53 = vpop.f32.mrf.mxu0 }
  0xc8   :  { %v1911_v57 = vadd.f32 %v243_v42, %v1860_v20  ;;  %v182_v14 = vpop.f32.mrf.mxu1  ;;  %v200_v53 = vadd.f32 %v1851_v8, %v73_v9  ;;  %v229_v8 = vadd.f32 %v1853_v11, %v1860_v20 }
  0xc9   :  { %2163 = vst [vmem:[#allocation24_spill] sm:$0xff] %v1908_v43  ;;  %v1913_v62 = vadd.f32 %v182_v14, %v72_v38 }
  0xca   :  { %2164 = vst [vmem:[#allocation25_spill] sm:$0xff] %v1911_v57 }
  0xcb   :  { %2165 = vst [vmem:[#allocation26_spill] sm:$0xff] %v1913_v62  ;;  %v1407_v3 = vpop.eup %1406 }
  0xcc   :  { %v498_v14 = vmul.f32 0.5, %v1407_v3 }
  0xce   :  { %v216_v6 = vpop.f32.mrf.mxu2 }
  0xcf   :  { %v1915_v5 = vadd.f32 %v216_v6, %v73_v9  ;;  %v245_v25 = vpop.f32.mrf.mxu3  ;;  %v499_v6 = vadd.f32 0.5, %v498_v14 }
  0xd0   :  { %v1918_v26 = vadd.f32 %v245_v25, %v1860_v20  ;;  %v185_v4 = vpop.f32.mrf.mxu1  ;;  %v171_v25 = vadd.f32 %v170_v35, %v72_v38 }
  0xd1   :  { %2166 = vst [vmem:[#allocation27_spill] sm:$0xff] %v1915_v5  ;;  %v1920_v10 = vadd.f32 %v185_v4, %v72_v38 }
  0xd2   :  { %2167 = vst [vmem:[#allocation28_spill] sm:$0xff] %v1918_v26 }
  0xd3   :  { %2168 = vst [vmem:[#allocation29_spill] sm:$0xff] %v1920_v10 }
  0xd6   :  { %v475_v42 = vpop.f32.mrf.mxu2 }
  0xd7   :  { %v494_v57 = vadd.f32 %v475_v42, %v200_v53  ;;  %v488_v12 = vpop.f32.mrf.mxu3 }
  0xd8   :  { %v187_v36 = vpop.f32.mrf.mxu1  ;;  %v495_v10 = vadd.f32 %v488_v12, %v229_v8 }
  0xd9   :  { %1408 = vtanh.f32 %v494_v57  ;;  %v1923_v61 = vadd.f32 %v187_v36, %v72_v38 }
  0xda   :  { %v505_v53 = vmul.f32 0.5, %v495_v10 }
  0xdb   :  { %2169 = vst [vmem:[#allocation30_spill] sm:$0xff] %v1923_v61 }
  0xde   :  { %v477_v5 = vpop.f32.mrf.mxu2 }
  0xdf   :  { %v1409_v43 = vpop.eup %1408  ;;  %v490_v26 = vpop.f32.mrf.mxu3 }
  0xe0   :  { %v510_v62 = vmul.f32 %v1409_v43, %v499_v6  ;;  %v462_v63 = vpop.f32.mrf.mxu1 }
  0xe1   :  { %v493_v4 = vadd.f32 %v462_v63, %v171_v25 }
  0xe3   :  { %v500_v9 = vmul.f32 0.5, %v493_v4 }
  0xe5   :  { %1410 = vtanh.f32 %v500_v9 }
  0xe6   :  { %1412 = vtanh.f32 %v505_v53 }
  0xe8   :  { %v464_v42 = vpop.f32.mrf.mxu1 }
  0xeb   :  { %v1411_v57 = vpop.eup %1410 }
  0xec   :  { %v502_v36 = vmul.f32 0.5, %v1411_v57  ;;  %v1413_v5 = vpop.eup %1412 }
  0xed   :  { %v507_v35 = vmul.f32 0.5, %v1413_v5 }
  0xee   :  { %v503_v3 = vadd.f32 0.5, %v502_v36 }
  0xef   :  { %v508_v38 = vadd.f32 0.5, %v507_v35 }
  0xf0   :  { %v509_v14 = vmul.f32 0.0, %v503_v3 }
  0xf2   :  { %v1927_v61 = vadd.f32 %v510_v62, %v509_v14 }
  0xf4   :  { %1414 = vtanh.f32 %v1927_v61 }
  0xfa   :  { %v1415_v26 = vpop.eup %1414 }
  0xfb   :  { %v513_v43 = vmul.f32 %v1415_v26, %v508_v38 }
  0xfd   :  { %v514_v11 = vpack.c.bf16 %v513_v43, %v513_v43 }
  0xff   :  { %523 = vmatmul.bf16.vlgmr.msra.gmra.mxu0 %v514_v11  ;;  %536 = vmatmul.bf16.vlgmr.msrb.gmra.mxu1 %v514_v11 }
 0x100   :  { %549 = vmatmul.bf16.vlgmr.msra.gmra.mxu2 %v514_v11  ;;  %562 = vmatmul.bf16.vlgmr.msra.gmra.mxu3 %v514_v11 }
 0x101   :  { %665 = vmatpush.bf16.msra.mxu0 %v1655_v23  ;;  %678 = vmatpush.bf16.msrb.mxu1 %v1647_v18 }
 0x102   :  { %691 = vmatpush.bf16.msra.mxu2 %v1649_v19  ;;  %704 = vmatpush.bf16.msra.mxu3 %v1659_v27 }
 0x105   :  { %666 = vmatpush.bf16.msra.mxu0 %v1668_v33  ;;  %679 = vmatpush.bf16.msrb.mxu1 %v1664_v31 }
 0x106   :  { %692 = vmatpush.bf16.msra.mxu2 %v1670_v34  ;;  %705 = vmatpush.bf16.msra.mxu3 %v1673_v40 }
 0x109   :  { %667 = vmatpush.bf16.msra.mxu0 %v1680_v46  ;;  %680 = vmatpush.bf16.msrb.mxu1 %v1676_v45 }
 0x10a   :  { %693 = vmatpush.bf16.msra.mxu2 %v1682_v48  ;;  %706 = vmatpush.bf16.msra.mxu3 %v1685_v51 }
 0x10d   :  { %668 = vmatpush.bf16.msra.mxu0 %v1691_v58  ;;  %681 = vmatpush.bf16.msrb.mxu1 %v1688_v56 }
 0x10e   :  { %694 = vmatpush.bf16.msra.mxu2 %v1694_v59  ;;  %707 = vmatpush.bf16.msra.mxu3 %v1702_v0 }
 0x111   :  { %669 = vmatpush.bf16.msra.mxu0 %v1706_v1  ;;  %682 = vmatpush.bf16.msrb.mxu1 %v1725_v17 }
 0x112   :  { %695 = vmatpush.bf16.msra.mxu2 %v1716_v7  ;;  %708 = vmatpush.bf16.msra.mxu3 %v1720_v15 }
 0x115   :  { %670 = vmatpush.bf16.msra.mxu0 %v1723_v16  ;;  %683 = vmatpush.bf16.msrb.mxu1 %v1734_v30 }
 0x116   :  { %696 = vmatpush.bf16.msra.mxu2 %v1728_v24  ;;  %709 = vmatpush.bf16.msra.mxu3 %v1732_v29 }
 0x119   :  { %671 = vmatpush.bf16.msra.mxu0 %v1737_v37  ;;  %684 = vmatpush.bf16.msrb.mxu1 %v1765_v60 }
 0x11a   :  { %697 = vmatpush.bf16.msra.mxu2 %v1740_v39  ;;  %710 = vmatpush.bf16.msra.mxu3 %v1744_v44 }
 0x11d   :  { %672 = vmatpush.bf16.msra.mxu0 %v1747_v50  ;;  %685 = vmatpush.bf16.msrb.mxu1 %v1770_v2 }
 0x11e   :  { %698 = vmatpush.bf16.msra.mxu2 %v1750_v52  ;;  %711 = vmatpush.bf16.msra.mxu3 %v1756_v54 }
 0x17c   :  { %v524_v20 = vpop.f32.mrf.mxu0  ;;  %v537_v62 = vpop.f32.mrf.mxu1 }
 0x17d   :  { %v567_v10 = vadd.f32 %v524_v20, %v1856_v13  ;;  %v568_v12 = vadd.f32 %v537_v62, %v1878_v55 }
 0x17f   :  { %v571_v6 = vmul.f32 0.5, %v567_v10  ;;  %v575_v25 = vmul.f32 0.5, %v568_v12 }
 0x181   :  { %1416 = vtanh.f32 %v571_v6 }
 0x182   :  { %1418 = vtanh.f32 %v575_v25 }
 0x183   :  { %v550_v63 = vpop.f32.mrf.mxu2  ;;  %v563_v4 = vpop.f32.mrf.mxu3 }
 0x184   :  { %v569_v8 = vadd.f32 %v550_v63, %v1862_v22  ;;  %v570_v9 = vadd.f32 %v563_v4, %v1865_v28  ;;  %v526_v53 = vpop.f32.mrf.mxu0  ;;  %v539_v42 = vpop.f32.mrf.mxu1 }
 0x186   :  { %1420 = vtanh.f32 %v569_v8  ;;  %v580_v57 = vmul.f32 0.5, %v570_v9 }
 0x187   :  { %v1417_v36 = vpop.eup %1416 }
 0x188   :  { %v1419_v3 = vpop.eup %1418  ;;  %v573_v14 = vmul.f32 0.5, %v1417_v36  ;;  %1422 = vtanh.f32 %v580_v57 }
 0x189   :  { %v577_v13 = vmul.f32 0.5, %v1419_v3 }
 0x18a   :  { %v574_v55 = vadd.f32 0.5, %v573_v14 }
 0x18b   :  { %v578_v5 = vadd.f32 0.5, %v577_v13  ;;  %v552_v35 = vpop.f32.mrf.mxu2  ;;  %v565_v38 = vpop.f32.mrf.mxu3 }
 0x18c   :  { %v1421_v26 = vpop.eup %1420 }
 0x18d   :  { %v584_v43 = vmul.f32 %v578_v5, %v1927_v61  ;;  %v585_v11 = vmul.f32 %v1421_v26, %v574_v55 }
 0x18e   :  { %v1423_v22 = vpop.eup %1422 }
 0x18f   :  { %v1967_v20 = vadd.f32 %v585_v11, %v584_v43  ;;  %v582_v28 = vmul.f32 0.5, %v1423_v22 }
 0x191   :  { %1424 = vtanh.f32 %v1967_v20  ;;  %v583_v62 = vadd.f32 0.5, %v582_v28 }
 0x197   :  { %v1425_v10 = vpop.eup %1424 }
 0x198   :  { %v588_v12 = vmul.f32 %v1425_v10, %v583_v62 }
 0x19a   :  { %v589_v6 = vpack.c.bf16 %v588_v12, %v588_v12 }
 0x19c   :  { %598 = vmatmul.bf16.vlgmr.msrb.gmra.mxu0 %v589_v6  ;;  %611 = vmatmul.bf16.vlgmr.msra.gmra.mxu1 %v589_v6 }
 0x19d   :  { %624 = vmatmul.bf16.vlgmr.msrb.gmra.mxu2 %v589_v6  ;;  %637 = vmatmul.bf16.vlgmr.msrb.gmra.mxu3 %v589_v6 }
 0x19e   :  { %740 = vmatpush.bf16.msrb.mxu0 %v1655_v23  ;;  %753 = vmatpush.bf16.msra.mxu1 %v1647_v18 }
 0x19f   :  { %766 = vmatpush.bf16.msrb.mxu2 %v1649_v19  ;;  %779 = vmatpush.bf16.msrb.mxu3 %v1659_v27 }
 0x1a2   :  { %741 = vmatpush.bf16.msrb.mxu0 %v1668_v33  ;;  %754 = vmatpush.bf16.msra.mxu1 %v1664_v31 }
 0x1a3   :  { %767 = vmatpush.bf16.msrb.mxu2 %v1670_v34  ;;  %780 = vmatpush.bf16.msrb.mxu3 %v1673_v40 }
 0x1a6   :  { %742 = vmatpush.bf16.msrb.mxu0 %v1680_v46  ;;  %755 = vmatpush.bf16.msra.mxu1 %v1676_v45 }
 0x1a7   :  { %768 = vmatpush.bf16.msrb.mxu2 %v1682_v48  ;;  %781 = vmatpush.bf16.msrb.mxu3 %v1685_v51 }
 0x1aa   :  { %743 = vmatpush.bf16.msrb.mxu0 %v1691_v58  ;;  %756 = vmatpush.bf16.msra.mxu1 %v1688_v56 }
 0x1ab   :  { %769 = vmatpush.bf16.msrb.mxu2 %v1694_v59  ;;  %782 = vmatpush.bf16.msrb.mxu3 %v1702_v0 }
 0x1ae   :  { %744 = vmatpush.bf16.msrb.mxu0 %v1706_v1  ;;  %757 = vmatpush.bf16.msra.mxu1 %v1725_v17 }
 0x1af   :  { %770 = vmatpush.bf16.msrb.mxu2 %v1716_v7  ;;  %783 = vmatpush.bf16.msrb.mxu3 %v1720_v15 }
 0x1b2   :  { %745 = vmatpush.bf16.msrb.mxu0 %v1723_v16  ;;  %758 = vmatpush.bf16.msra.mxu1 %v1734_v30 }
 0x1b3   :  { %771 = vmatpush.bf16.msrb.mxu2 %v1728_v24  ;;  %784 = vmatpush.bf16.msrb.mxu3 %v1732_v29 }
 0x1b6   :  { %746 = vmatpush.bf16.msrb.mxu0 %v1737_v37  ;;  %759 = vmatpush.bf16.msra.mxu1 %v1765_v60 }
 0x1b7   :  { %772 = vmatpush.bf16.msrb.mxu2 %v1740_v39  ;;  %785 = vmatpush.bf16.msrb.mxu3 %v1744_v44 }
 0x1ba   :  { %747 = vmatpush.bf16.msrb.mxu0 %v1747_v50  ;;  %760 = vmatpush.bf16.msra.mxu1 %v1770_v2 }
 0x1bb   :  { %773 = vmatpush.bf16.msrb.mxu2 %v1750_v52  ;;  %786 = vmatpush.bf16.msrb.mxu3 %v1756_v54 }
 0x219   :  { %v599_v61 = vpop.f32.mrf.mxu0  ;;  %v612_v25 = vpop.f32.mrf.mxu1 }
 0x21a   :  { %v642_v63 = vadd.f32 %v599_v61, %v1868_v32  ;;  %v643_v4 = vadd.f32 %v612_v25, %v1888_v21 }
 0x21c   :  { %v646_v8 = vmul.f32 0.5, %v642_v63  ;;  %v650_v9 = vmul.f32 0.5, %v643_v4  ;;  %v2170_v4 = vld [vmem:[#allocation20_spill] sm:$0xff] }
 0x21e   :  { %1426 = vtanh.f32 %v646_v8 }
 0x21f   :  { %1428 = vtanh.f32 %v650_v9 }
 0x220   :  { %v625_v53 = vpop.f32.mrf.mxu2  ;;  %v638_v42 = vpop.f32.mrf.mxu3 }
 0x221   :  { %v644_v57 = vadd.f32 %v625_v53, %v1870_v41  ;;  %v645_v36 = vadd.f32 %v638_v42, %v1873_v47  ;;  %v601_v3 = vpop.f32.mrf.mxu0  ;;  %v614_v14 = vpop.f32.mrf.mxu1 }
 0x222   :  { %v2172_v14 = vld [vmem:[#allocation15_spill] sm:$0xff] }
 0x223   :  { %1430 = vtanh.f32 %v644_v57  ;;  %v655_v13 = vmul.f32 0.5, %v645_v36  ;;  %v2171_v36 = vld [vmem:[#allocation14_spill] sm:$0xff] }
 0x224   :  { %v1427_v55 = vpop.eup %1426 }
 0x225   :  { %v1429_v5 = vpop.eup %1428  ;;  %v648_v35 = vmul.f32 0.5, %v1427_v55  ;;  %1432 = vtanh.f32 %v655_v13 }
 0x226   :  { %v652_v32 = vmul.f32 0.5, %v1429_v5 }
 0x227   :  { %v649_v21 = vadd.f32 0.5, %v648_v35 }
 0x228   :  { %v653_v38 = vadd.f32 0.5, %v652_v32  ;;  %v627_v26 = vpop.f32.mrf.mxu2  ;;  %v640_v43 = vpop.f32.mrf.mxu3 }
 0x229   :  { %v1431_v11 = vpop.eup %1430 }
 0x22a   :  { %v659_v22 = vmul.f32 %v653_v38, %v1967_v20  ;;  %v660_v28 = vmul.f32 %v1431_v11, %v649_v21 }
 0x22b   :  { %v1433_v41 = vpop.eup %1432 }
 0x22c   :  { %v2007_v62 = vadd.f32 %v660_v28, %v659_v22  ;;  %v657_v47 = vmul.f32 0.5, %v1433_v41 }
 0x22e   :  { %1434 = vtanh.f32 %v2007_v62  ;;  %v658_v10 = vadd.f32 0.5, %v657_v47 }
 0x234   :  { %v1435_v12 = vpop.eup %1434 }
 0x235   :  { %v663_v6 = vmul.f32 %v1435_v12, %v658_v10 }
 0x237   :  { %v664_v61 = vpack.c.bf16 %v663_v6, %v663_v6 }
 0x239   :  { %673 = vmatmul.bf16.vlgmr.msra.gmra.mxu0 %v664_v61  ;;  %686 = vmatmul.bf16.vlgmr.msrb.gmra.mxu1 %v664_v61 }
 0x23a   :  { %699 = vmatmul.bf16.vlgmr.msra.gmra.mxu2 %v664_v61  ;;  %712 = vmatmul.bf16.vlgmr.msra.gmra.mxu3 %v664_v61 }
 0x23b   :  { %815 = vmatpush.bf16.msra.mxu0 %v1655_v23  ;;  %828 = vmatpush.bf16.msrb.mxu1 %v1647_v18 }
 0x23c   :  { %841 = vmatpush.bf16.msra.mxu2 %v1649_v19  ;;  %854 = vmatpush.bf16.msra.mxu3 %v1659_v27 }
 0x23f   :  { %816 = vmatpush.bf16.msra.mxu0 %v1668_v33  ;;  %829 = vmatpush.bf16.msrb.mxu1 %v1664_v31 }
 0x240   :  { %842 = vmatpush.bf16.msra.mxu2 %v1670_v34  ;;  %855 = vmatpush.bf16.msra.mxu3 %v1673_v40 }
 0x243   :  { %817 = vmatpush.bf16.msra.mxu0 %v1680_v46  ;;  %830 = vmatpush.bf16.msrb.mxu1 %v1676_v45 }
 0x244   :  { %843 = vmatpush.bf16.msra.mxu2 %v1682_v48  ;;  %856 = vmatpush.bf16.msra.mxu3 %v1685_v51 }
 0x247   :  { %818 = vmatpush.bf16.msra.mxu0 %v1691_v58  ;;  %831 = vmatpush.bf16.msrb.mxu1 %v1688_v56 }
 0x248   :  { %844 = vmatpush.bf16.msra.mxu2 %v1694_v59  ;;  %857 = vmatpush.bf16.msra.mxu3 %v1702_v0 }
 0x24b   :  { %819 = vmatpush.bf16.msra.mxu0 %v1706_v1  ;;  %832 = vmatpush.bf16.msrb.mxu1 %v1725_v17 }
 0x24c   :  { %845 = vmatpush.bf16.msra.mxu2 %v1716_v7  ;;  %858 = vmatpush.bf16.msra.mxu3 %v1720_v15 }
 0x24f   :  { %820 = vmatpush.bf16.msra.mxu0 %v1723_v16  ;;  %833 = vmatpush.bf16.msrb.mxu1 %v1734_v30 }
 0x250   :  { %846 = vmatpush.bf16.msra.mxu2 %v1728_v24  ;;  %859 = vmatpush.bf16.msra.mxu3 %v1732_v29 }
 0x253   :  { %821 = vmatpush.bf16.msra.mxu0 %v1737_v37  ;;  %834 = vmatpush.bf16.msrb.mxu1 %v1765_v60 }
 0x254   :  { %847 = vmatpush.bf16.msra.mxu2 %v1740_v39  ;;  %860 = vmatpush.bf16.msra.mxu3 %v1744_v44 }
 0x257   :  { %822 = vmatpush.bf16.msra.mxu0 %v1747_v50  ;;  %835 = vmatpush.bf16.msrb.mxu1 %v1770_v2 }
 0x258   :  { %848 = vmatpush.bf16.msra.mxu2 %v1750_v52  ;;  %861 = vmatpush.bf16.msra.mxu3 %v1756_v54 }
 0x2b6   :  { %v674_v20 = vpop.f32.mrf.mxu0  ;;  %v687_v25 = vpop.f32.mrf.mxu1 }
 0x2b7   :  { %v717_v63 = vadd.f32 %v674_v20, %v1876_v49  ;;  %v718_v8 = vadd.f32 %v687_v25, %v2170_v4 }
 0x2b9   :  { %v721_v9 = vmul.f32 0.5, %v717_v63  ;;  %v725_v53 = vmul.f32 0.5, %v718_v8  ;;  %v2173_v8 = vld [vmem:[#allocation16_spill] sm:$0xff] }
 0x2bb   :  { %1436 = vtanh.f32 %v721_v9 }
 0x2bc   :  { %1438 = vtanh.f32 %v725_v53  ;;  %v2174_v53 = vld [vmem:[#allocation23_spill] sm:$0xff] }
 0x2bd   :  { %v700_v42 = vpop.f32.mrf.mxu2  ;;  %v713_v57 = vpop.f32.mrf.mxu3 }
 0x2be   :  { %v719_v3 = vadd.f32 %v700_v42, %v2171_v36  ;;  %v720_v13 = vadd.f32 %v713_v57, %v2172_v14  ;;  %v676_v55 = vpop.f32.mrf.mxu0  ;;  %v689_v5 = vpop.f32.mrf.mxu1 }
 0x2bf   :  { %v2176_v5 = vld [vmem:[#allocation18_spill] sm:$0xff] }
 0x2c0   :  { %1440 = vtanh.f32 %v719_v3  ;;  %v730_v35 = vmul.f32 0.5, %v720_v13  ;;  %v2175_v13 = vld [vmem:[#allocation17_spill] sm:$0xff] }
 0x2c1   :  { %v1437_v32 = vpop.eup %1436 }
 0x2c2   :  { %v1439_v21 = vpop.eup %1438  ;;  %v723_v38 = vmul.f32 0.5, %v1437_v32  ;;  %1442 = vtanh.f32 %v730_v35 }
 0x2c3   :  { %v727_v49 = vmul.f32 0.5, %v1439_v21 }
 0x2c4   :  { %v724_v26 = vadd.f32 0.5, %v723_v38 }
 0x2c5   :  { %v728_v43 = vadd.f32 0.5, %v727_v49  ;;  %v702_v11 = vpop.f32.mrf.mxu2  ;;  %v715_v22 = vpop.f32.mrf.mxu3 }
 0x2c6   :  { %v1441_v28 = vpop.eup %1440 }
 0x2c7   :  { %v734_v41 = vmul.f32 %v728_v43, %v2007_v62  ;;  %v735_v47 = vmul.f32 %v1441_v28, %v724_v26 }
 0x2c8   :  { %v1443_v10 = vpop.eup %1442 }
 0x2c9   :  { %v2047_v12 = vadd.f32 %v735_v47, %v734_v41  ;;  %v732_v6 = vmul.f32 0.5, %v1443_v10 }
 0x2cb   :  { %1444 = vtanh.f32 %v2047_v12  ;;  %v733_v61 = vadd.f32 0.5, %v732_v6 }
 0x2d1   :  { %v1445_v20 = vpop.eup %1444 }
 0x2d2   :  { %v738_v25 = vmul.f32 %v1445_v20, %v733_v61 }
 0x2d4   :  { %v739_v63 = vpack.c.bf16 %v738_v25, %v738_v25 }
 0x2d6   :  { %748 = vmatmul.bf16.vlgmr.msrb.gmra.mxu0 %v739_v63  ;;  %761 = vmatmul.bf16.vlgmr.msra.gmra.mxu1 %v739_v63 }
 0x2d7   :  { %774 = vmatmul.bf16.vlgmr.msrb.gmra.mxu2 %v739_v63  ;;  %787 = vmatmul.bf16.vlgmr.msrb.gmra.mxu3 %v739_v63 }
 0x2d8   :  { %890 = vmatpush.bf16.msrb.mxu0 %v1655_v23  ;;  %903 = vmatpush.bf16.msra.mxu1 %v1647_v18 }
 0x2d9   :  { %916 = vmatpush.bf16.msrb.mxu2 %v1649_v19  ;;  %929 = vmatpush.bf16.msrb.mxu3 %v1659_v27 }
 0x2dc   :  { %891 = vmatpush.bf16.msrb.mxu0 %v1668_v33  ;;  %904 = vmatpush.bf16.msra.mxu1 %v1664_v31 }
 0x2dd   :  { %917 = vmatpush.bf16.msrb.mxu2 %v1670_v34  ;;  %930 = vmatpush.bf16.msrb.mxu3 %v1673_v40 }
 0x2e0   :  { %892 = vmatpush.bf16.msrb.mxu0 %v1680_v46  ;;  %905 = vmatpush.bf16.msra.mxu1 %v1676_v45 }
 0x2e1   :  { %918 = vmatpush.bf16.msrb.mxu2 %v1682_v48  ;;  %931 = vmatpush.bf16.msrb.mxu3 %v1685_v51 }
 0x2e4   :  { %893 = vmatpush.bf16.msrb.mxu0 %v1691_v58  ;;  %906 = vmatpush.bf16.msra.mxu1 %v1688_v56 }
 0x2e5   :  { %919 = vmatpush.bf16.msrb.mxu2 %v1694_v59  ;;  %932 = vmatpush.bf16.msrb.mxu3 %v1702_v0 }
 0x2e8   :  { %894 = vmatpush.bf16.msrb.mxu0 %v1706_v1  ;;  %907 = vmatpush.bf16.msra.mxu1 %v1725_v17 }
 0x2e9   :  { %920 = vmatpush.bf16.msrb.mxu2 %v1716_v7  ;;  %933 = vmatpush.bf16.msrb.mxu3 %v1720_v15 }
 0x2ec   :  { %895 = vmatpush.bf16.msrb.mxu0 %v1723_v16  ;;  %908 = vmatpush.bf16.msra.mxu1 %v1734_v30 }
 0x2ed   :  { %921 = vmatpush.bf16.msrb.mxu2 %v1728_v24  ;;  %934 = vmatpush.bf16.msrb.mxu3 %v1732_v29 }
 0x2f0   :  { %896 = vmatpush.bf16.msrb.mxu0 %v1737_v37  ;;  %909 = vmatpush.bf16.msra.mxu1 %v1765_v60 }
 0x2f1   :  { %922 = vmatpush.bf16.msrb.mxu2 %v1740_v39  ;;  %935 = vmatpush.bf16.msrb.mxu3 %v1744_v44 }
 0x2f4   :  { %897 = vmatpush.bf16.msrb.mxu0 %v1747_v50  ;;  %910 = vmatpush.bf16.msra.mxu1 %v1770_v2 }
 0x2f5   :  { %923 = vmatpush.bf16.msrb.mxu2 %v1750_v52  ;;  %936 = vmatpush.bf16.msrb.mxu3 %v1756_v54 }
 0x353   :  { %v749_v62 = vpop.f32.mrf.mxu0  ;;  %v762_v4 = vpop.f32.mrf.mxu1 }
 0x354   :  { %v792_v9 = vadd.f32 %v749_v62, %v2173_v8  ;;  %v793_v42 = vadd.f32 %v762_v4, %v2174_v53 }
 0x356   :  { %v796_v57 = vmul.f32 0.5, %v792_v9  ;;  %v800_v36 = vmul.f32 0.5, %v793_v42 }
 0x358   :  { %1446 = vtanh.f32 %v796_v57 }
 0x359   :  { %1448 = vtanh.f32 %v800_v36 }
 0x35a   :  { %v775_v3 = vpop.f32.mrf.mxu2  ;;  %v788_v14 = vpop.f32.mrf.mxu3 }
 0x35b   :  { %v794_v55 = vadd.f32 %v775_v3, %v2175_v13  ;;  %v795_v35 = vadd.f32 %v788_v14, %v2176_v5  ;;  %v751_v32 = vpop.f32.mrf.mxu0  ;;  %v764_v21 = vpop.f32.mrf.mxu1  ;;  %v2181_v3 = vld [vmem:[#allocation12_spill] sm:$0xff]  ;;  %v2182_v13 = vld [vmem:[#allocation29_spill] sm:$0xff] }
 0x35d   :  { %1450 = vtanh.f32 %v794_v55  ;;  %v805_v38 = vmul.f32 0.5, %v795_v35 }
 0x35e   :  { %v1447_v49 = vpop.eup %1446 }
 0x35f   :  { %v1449_v26 = vpop.eup %1448  ;;  %v798_v43 = vmul.f32 0.5, %v1447_v49  ;;  %1452 = vtanh.f32 %v805_v38  ;;  %v2183_v38 = vld [vmem:[#allocation24_spill] sm:$0xff] }
 0x360   :  { %v802_v11 = vmul.f32 0.5, %v1449_v26  ;;  %v2184_v26 = vld [vmem:[#allocation25_spill] sm:$0xff] }
 0x361   :  { %v799_v22 = vadd.f32 0.5, %v798_v43 }
 0x362   :  { %v803_v28 = vadd.f32 0.5, %v802_v11  ;;  %v777_v41 = vpop.f32.mrf.mxu2  ;;  %v790_v47 = vpop.f32.mrf.mxu3 }
 0x363   :  { %v1451_v10 = vpop.eup %1450 }
 0x364   :  { %v809_v6 = vmul.f32 %v803_v28, %v2047_v12  ;;  %v810_v61 = vmul.f32 %v1451_v10, %v799_v22 }
 0x365   :  { %v1453_v20 = vpop.eup %1452 }
 0x366   :  { %v2087_v25 = vadd.f32 %v810_v61, %v809_v6  ;;  %v807_v63 = vmul.f32 0.5, %v1453_v20 }
 0x368   :  { %1454 = vtanh.f32 %v2087_v25  ;;  %v808_v62 = vadd.f32 0.5, %v807_v63 }
 0x36e   :  { %v1455_v4 = vpop.eup %1454 }
 0x36f   :  { %v813_v8 = vmul.f32 %v1455_v4, %v808_v62 }
 0x371   :  { %v814_v9 = vpack.c.bf16 %v813_v8, %v813_v8 }
 0x373   :  { %823 = vmatmul.bf16.vlgmr.msra.gmra.mxu0 %v814_v9  ;;  %836 = vmatmul.bf16.vlgmr.msrb.gmra.mxu1 %v814_v9 }
 0x374   :  { %849 = vmatmul.bf16.vlgmr.msra.gmra.mxu2 %v814_v9  ;;  %862 = vmatmul.bf16.vlgmr.msra.gmra.mxu3 %v814_v9 }
 0x375   :  { %965 = vmatpush.bf16.msra.mxu0 %v1655_v23  ;;  %978 = vmatpush.bf16.msrb.mxu1 %v1647_v18  ;;  %v2177_v23 = vld [vmem:[#allocation19_spill] sm:$0xff] }
 0x376   :  { %991 = vmatpush.bf16.msra.mxu2 %v1649_v19  ;;  %1004 = vmatpush.bf16.msra.mxu3 %v1659_v27 }
 0x379   :  { %966 = vmatpush.bf16.msra.mxu0 %v1668_v33  ;;  %979 = vmatpush.bf16.msrb.mxu1 %v1664_v31  ;;  %v2178_v31 = vld [vmem:[#allocation26_spill] sm:$0xff] }
 0x37a   :  { %992 = vmatpush.bf16.msra.mxu2 %v1670_v34  ;;  %1005 = vmatpush.bf16.msra.mxu3 %v1673_v40 }
 0x37d   :  { %967 = vmatpush.bf16.msra.mxu0 %v1680_v46  ;;  %980 = vmatpush.bf16.msrb.mxu1 %v1676_v45 }
 0x37e   :  { %993 = vmatpush.bf16.msra.mxu2 %v1682_v48  ;;  %1006 = vmatpush.bf16.msra.mxu3 %v1685_v51  ;;  %v2179_v48 = vld [vmem:[#allocation21_spill] sm:$0xff] }
 0x381   :  { %968 = vmatpush.bf16.msra.mxu0 %v1691_v58  ;;  %981 = vmatpush.bf16.msrb.mxu1 %v1688_v56  ;;  %v2180_v56 = vld [vmem:[#allocation22_spill] sm:$0xff] }
 0x382   :  { %994 = vmatpush.bf16.msra.mxu2 %v1694_v59  ;;  %1007 = vmatpush.bf16.msra.mxu3 %v1702_v0 }
 0x385   :  { %969 = vmatpush.bf16.msra.mxu0 %v1706_v1  ;;  %982 = vmatpush.bf16.msrb.mxu1 %v1725_v17 }
 0x386   :  { %995 = vmatpush.bf16.msra.mxu2 %v1716_v7  ;;  %1008 = vmatpush.bf16.msra.mxu3 %v1720_v15 }
 0x389   :  { %970 = vmatpush.bf16.msra.mxu0 %v1723_v16  ;;  %983 = vmatpush.bf16.msrb.mxu1 %v1734_v30 }
 0x38a   :  { %996 = vmatpush.bf16.msra.mxu2 %v1728_v24  ;;  %1009 = vmatpush.bf16.msra.mxu3 %v1732_v29 }
 0x38d   :  { %971 = vmatpush.bf16.msra.mxu0 %v1737_v37  ;;  %984 = vmatpush.bf16.msrb.mxu1 %v1765_v60 }
 0x38e   :  { %997 = vmatpush.bf16.msra.mxu2 %v1740_v39  ;;  %1010 = vmatpush.bf16.msra.mxu3 %v1744_v44 }
 0x391   :  { %972 = vmatpush.bf16.msra.mxu0 %v1747_v50  ;;  %985 = vmatpush.bf16.msrb.mxu1 %v1770_v2 }
 0x392   :  { %998 = vmatpush.bf16.msra.mxu2 %v1750_v52  ;;  %1011 = vmatpush.bf16.msra.mxu3 %v1756_v54 }
 0x3f0   :  { %v824_v18 = vpop.f32.mrf.mxu0  ;;  %v837_v19 = vpop.f32.mrf.mxu1 }
 0x3f1   :  { %v867_v27 = vadd.f32 %v824_v18, %v2177_v23  ;;  %v868_v33 = vadd.f32 %v837_v19, %v2178_v31 }
 0x3f3   :  { %v871_v34 = vmul.f32 0.5, %v867_v27  ;;  %v875_v40 = vmul.f32 0.5, %v868_v33 }
 0x3f5   :  { %1456 = vtanh.f32 %v871_v34  ;;  %v1395_v34 = vld [vmem:[#allocation5 + $0x38] sm:$0xff] }
 0x3f6   :  { %1458 = vtanh.f32 %v875_v40  ;;  %v1394_v40 = vld [vmem:[#allocation5 + $0x30] sm:$0xff] }
 0x3f7   :  { %v850_v45 = vpop.f32.mrf.mxu2  ;;  %v863_v46 = vpop.f32.mrf.mxu3 }
 0x3f8   :  { %v869_v51 = vadd.f32 %v850_v45, %v2179_v48  ;;  %v870_v58 = vadd.f32 %v863_v46, %v2180_v56  ;;  %v826_v59 = vpop.f32.mrf.mxu0  ;;  %v839_v0 = vpop.f32.mrf.mxu1  ;;  %v1393_v45 = vld [vmem:[#allocation5 + $0x28] sm:$0xff]  ;;  %v1392_v46 = vld [vmem:[#allocation5 + $0x20] sm:$0xff]  ;;  %v1391_v48 = vld [vmem:[#allocation5 + $0x18] sm:$0xff] }
 0x3f9   :  { %v1389_v56 = vld [vmem:[#allocation5 + $0x8] sm:$0xff]  ;;  %v2186_v0 = vld [vmem:[#allocation13_spill] sm:$0xff] }
 0x3fa   :  { %1460 = vtanh.f32 %v869_v51  ;;  %v880_v1 = vmul.f32 0.5, %v870_v58  ;;  %v1390_v51 = vld [vmem:[#allocation5 + $0x10] sm:$0xff]  ;;  %v1388_v58 = vld [vmem:[#allocation5] sm:$0xff]  ;;  %v2185_v59 = vld [vmem:[#allocation11_spill] sm:$0xff] }
 0x3fb   :  { %v1457_v7 = vpop.eup %1456 }
 0x3fc   :  { %v1459_v15 = vpop.eup %1458  ;;  %v873_v16 = vmul.f32 0.5, %v1457_v7  ;;  %1462 = vtanh.f32 %v880_v1  ;;  %v159_v1 = vadd.f32 %v2186_v0, %v2185_v59 }
 0x3fd   :  { %v877_v17 = vmul.f32 0.5, %v1459_v15 }
 0x3fe   :  { %v874_v24 = vadd.f32 0.5, %v873_v16 }
 0x3ff   :  { %v878_v29 = vadd.f32 0.5, %v877_v17  ;;  %v852_v30 = vpop.f32.mrf.mxu2  ;;  %v865_v37 = vpop.f32.mrf.mxu3  ;;  %v2187_v17 = vld [vmem:[#allocation30_spill] sm:$0xff] }
 0x400   :  { %v1461_v39 = vpop.eup %1460 }
 0x401   :  { %v884_v44 = vmul.f32 %v878_v29, %v2087_v25  ;;  %v885_v50 = vmul.f32 %v1461_v39, %v874_v24 }
 0x402   :  { %v1463_v52 = vpop.eup %1462 }
 0x403   :  { %v886_v54 = vadd.f32 %v885_v50, %v884_v44  ;;  %v882_v60 = vmul.f32 0.5, %v1463_v52  ;;  %v2188_v44 = vld [vmem:[#allocation27_spill] sm:$0xff]  ;;  %v2189_v52 = vld [vmem:[#allocation28_spill] sm:$0xff] }
 0x405   :  { %1464 = vtanh.f32 %v886_v54  ;;  %v883_v2 = vadd.f32 0.5, %v882_v60 }
 0x40b   :  { %v1465_v12 = vpop.eup %1464 }
 0x40c   :  { %v888_v53 = vmul.f32 %v1465_v12, %v883_v2 }
 0x40e   :  { %v889_v42 = vpack.c.bf16 %v888_v53, %v888_v53 }
 0x410   :  { %898 = vmatmul.bf16.vlgmr.msrb.gmra.mxu0 %v889_v42  ;;  %911 = vmatmul.bf16.vlgmr.msra.gmra.mxu1 %v889_v42 }
 0x411   :  { %924 = vmatmul.bf16.vlgmr.msrb.gmra.mxu2 %v889_v42  ;;  %937 = vmatmul.bf16.vlgmr.msrb.gmra.mxu3 %v889_v42 }
 0x412   :  { %1108 = vmatpush.bf16.msrb.mxu0 %v1395_v34 }
 0x416   :  { %1109 = vmatpush.bf16.msrb.mxu0 %v1394_v40 }
 0x41a   :  { %1110 = vmatpush.bf16.msrb.mxu0 %v1393_v45 }
 0x41e   :  { %1111 = vmatpush.bf16.msrb.mxu0 %v1392_v46 }
 0x422   :  { %1112 = vmatpush.bf16.msrb.mxu0 %v1391_v48 }
 0x426   :  { %1113 = vmatpush.bf16.msrb.mxu0 %v1390_v51 }
 0x42a   :  { %1114 = vmatpush.bf16.msrb.mxu0 %v1389_v56 }
 0x42e   :  { %1115 = vmatpush.bf16.msrb.mxu0 %v1388_v58 }
 0x48d   :  { %v899_v57 = vpop.f32.mrf.mxu0  ;;  %v912_v36 = vpop.f32.mrf.mxu1 }
 0x48e   :  { %v942_v14 = vadd.f32 %v899_v57, %v2181_v3  ;;  %v943_v55 = vadd.f32 %v912_v36, %v2182_v13 }
 0x490   :  { %v946_v5 = vmul.f32 0.5, %v942_v14  ;;  %v950_v35 = vmul.f32 0.5, %v943_v55 }
 0x492   :  { %1466 = vtanh.f32 %v946_v5 }
 0x493   :  { %1468 = vtanh.f32 %v950_v35 }
 0x494   :  { %v925_v32 = vpop.f32.mrf.mxu2  ;;  %v938_v21 = vpop.f32.mrf.mxu3 }
 0x495   :  { %v944_v49 = vadd.f32 %v925_v32, %v2183_v38  ;;  %v945_v43 = vadd.f32 %v938_v21, %v2184_v26  ;;  %v901_v11 = vpop.f32.mrf.mxu0  ;;  %v914_v22 = vpop.f32.mrf.mxu1 }
 0x497   :  { %1470 = vtanh.f32 %v944_v49  ;;  %v955_v28 = vmul.f32 0.5, %v945_v43 }
 0x498   :  { %v1467_v41 = vpop.eup %1466 }
 0x499   :  { %v1469_v47 = vpop.eup %1468  ;;  %v948_v10 = vmul.f32 0.5, %v1467_v41  ;;  %1472 = vtanh.f32 %v955_v28  ;;  %v1405_v28 = vld [vmem:[%s2147_s5] ss:$0 sm:$0xff] }
 0x49a   :  { %v952_v6 = vmul.f32 0.5, %v1469_v47 }
 0x49b   :  { %v949_v61 = vadd.f32 0.5, %v948_v10 }
 0x49c   :  { %v953_v20 = vadd.f32 0.5, %v952_v6  ;;  %v927_v25 = vpop.f32.mrf.mxu2  ;;  %v940_v63 = vpop.f32.mrf.mxu3 }
 0x49d   :  { %v1471_v62 = vpop.eup %1470 }
 0x49e   :  { %v959_v4 = vmul.f32 %v953_v20, %v886_v54  ;;  %v960_v8 = vmul.f32 %v1471_v62, %v949_v61 }
 0x49f   :  { %v1473_v9 = vpop.eup %1472 }
 0x4a0   :  { %v961_v18 = vadd.f32 %v960_v8, %v959_v4  ;;  %v957_v19 = vmul.f32 0.5, %v1473_v9 }
 0x4a2   :  { %1474 = vtanh.f32 %v961_v18  ;;  %v958_v23 = vadd.f32 0.5, %v957_v19 }
 0x4a8   :  { %v1475_v27 = vpop.eup %1474 }
 0x4a9   :  { %v963_v31 = vmul.f32 %v1475_v27, %v958_v23 }
 0x4ab   :  { %v964_v33 = vpack.c.bf16 %v963_v31, %v963_v31 }
 0x4ad   :  { %973 = vmatmul.bf16.vlgmr.msra.gmra.mxu0 %v964_v33  ;;  %986 = vmatmul.bf16.vlgmr.msrb.gmra.mxu1 %v964_v33 }
 0x4ae   :  { %999 = vmatmul.bf16.vlgmr.msra.gmra.mxu2 %v964_v33  ;;  %1012 = vmatmul.bf16.vlgmr.msra.gmra.mxu3 %v964_v33 }
 0x52a   :  { %v974_v7 = vpop.f32.mrf.mxu0  ;;  %v987_v15 = vpop.f32.mrf.mxu1 }
 0x52b   :  { %v1017_v16 = vadd.f32 %v974_v7, %v159_v1  ;;  %v1018_v24 = vadd.f32 %v987_v15, %v2187_v17 }
 0x52d   :  { %v1021_v29 = vmul.f32 0.5, %v1017_v16  ;;  %v1025_v30 = vmul.f32 0.5, %v1018_v24 }
 0x52f   :  { %1476 = vtanh.f32 %v1021_v29 }
 0x530   :  { %1478 = vtanh.f32 %v1025_v30 }
 0x531   :  { %v1000_v37 = vpop.f32.mrf.mxu2  ;;  %v1013_v39 = vpop.f32.mrf.mxu3 }
 0x532   :  { %v1019_v50 = vadd.f32 %v1000_v37, %v2188_v44  ;;  %v1020_v54 = vadd.f32 %v1013_v39, %v2189_v52  ;;  %v976_v60 = vpop.f32.mrf.mxu0  ;;  %v989_v2 = vpop.f32.mrf.mxu1 }
 0x534   :  { %1480 = vtanh.f32 %v1019_v50  ;;  %v1030_v12 = vmul.f32 0.5, %v1020_v54 }
 0x535   :  { %v1477_v53 = vpop.eup %1476 }
 0x536   :  { %v1479_v42 = vpop.eup %1478  ;;  %v1023_v57 = vmul.f32 0.5, %v1477_v53  ;;  %1482 = vtanh.f32 %v1030_v12 }
 0x537   :  { %v1027_v36 = vmul.f32 0.5, %v1479_v42 }
 0x538   :  { %v1024_v3 = vadd.f32 0.5, %v1023_v57 }
 0x539   :  { %v1028_v14 = vadd.f32 0.5, %v1027_v36  ;;  %v1002_v13 = vpop.f32.mrf.mxu2  ;;  %v1015_v55 = vpop.f32.mrf.mxu3 }
 0x53a   :  { %v1481_v5 = vpop.eup %1480 }
 0x53b   :  { %v1034_v35 = vmul.f32 %v1028_v14, %v961_v18  ;;  %v1035_v32 = vmul.f32 %v1481_v5, %v1024_v3 }
 0x53c   :  { %v1483_v21 = vpop.eup %1482 }
 0x53d   :  { %v1036_v38 = vadd.f32 %v1035_v32, %v1034_v35  ;;  %v1032_v49 = vmul.f32 0.5, %v1483_v21 }
 0x53f   :  { %1484 = vtanh.f32 %v1036_v38  ;;  %v1033_v26 = vadd.f32 0.5, %v1032_v49 }
 0x545   :  { %v1485_v43 = vpop.eup %1484 }
 0x546   :  { %v1038_v11 = vmul.f32 %v1485_v43, %v1033_v26 }
 0x548   :  { %v1039_v22 = vpack.c.bf16 %v1038_v11, %v1038_v11 }
 0x54a   :  { %1116 = vmatmul.bf16.vlgmr.msrb.gmra.mxu0 %v1039_v22 }
 0x5c7   :  { %v1117_v41 = vpop.f32.mrf.mxu0 }
 0x5c8   :  { %v1118_v47 = vadd.f32 %v1405_v28, %v1117_v41 }
 0x5ca   :  { %1121 = vst [vmem:[#allocation7] sm:$0xff] %v1118_v47 }
 0x5cb   :  { %1132 = dma.vmem_to_hbm [thread:$0]  %s1128_s2, 128, %s1130_s4, [#allocation4]  }
 0x5cf   :  { %v1119_v10 = vpop.f32.mrf.mxu0 }
 0x5d0   :  { %1562 = dma.done.wait [#allocation4], 128  }
 0x5d1   :  { %1563 = vsyncadd [#allocation4], 4294967168 }
 0x5d2   :  { %1137 = vsyncpa [#allocation3], 1 }
 0x5d3   :  { %1138 = vsyncpa [#allocation6], 1 }
 0x5d4   :  { %1139 = vsyncpa [#allocation4], 1 }

</bundles_post_ra>
